<compile_context>
chip_gen: v6e
topology: v6e:2x2x1
jax: 0.10.0
libtpu: 0.0.40
codegen_flags: <defaults>
</compile_context>

<pallas_src>
import math
import functools

import jax
import jax.numpy as jnp
from jax.experimental import pallas as pl
from jax.experimental.pallas import tpu as pltpu  # noqa: F401  (kept for TPU-backend clarity)

MODEL_SIZE = 32
NUM_HEADS = 4
HIDDEN_SIZE = 64
NUM_LAYERS = 2
SEQ = 8
BATCH = 2


# ----------------------------- kernel -------------------------------------- #

def _layernorm(x, gamma, beta, eps=1e-5):
    mu = jnp.mean(x, axis=-1, keepdims=True)
    var = jnp.mean((x - mu) ** 2, axis=-1, keepdims=True)
    return (x - mu) * jax.lax.rsqrt(var + eps) * gamma + beta


def fused_forward_kernel(x_ref, pe_ref,
                         wqkv_ref, bqkv_ref, wo_ref, bo_ref,
                         g1_ref, bn1_ref, w1_ref, b1_ref,
                         w2_ref, b2_ref, g2_ref, bn2_ref,
                         dec_w_ref, dec_b_ref, o_ref,
                         *, num_layers, num_heads, batch, seq, scale):
    D = x_ref.shape[-1]
    hd = D // num_heads
    inv_sqrt_hd = 1.0 / math.sqrt(hd)

    # positional encoding (dropout = identity in eval): y = x * sqrt(model_size) + pe
    y = x_ref[...] * scale + pe_ref[...]                      # (B*S, D)

    # lane-index vector used for per-head masks (avoids lane slicing / concat relayouts)
    lane = jax.lax.broadcasted_iota(jnp.int32, (1, 1, D), 2)  # (1, 1, D)

    for l in range(num_layers):                               # static unroll over layers
        # ---------- multi-head self-attention ----------
        q = jnp.dot(y, wqkv_ref[l, 0], preferred_element_type=jnp.float32) + bqkv_ref[l, 0]
        k = jnp.dot(y, wqkv_ref[l, 1], preferred_element_type=jnp.float32) + bqkv_ref[l, 1]
        v = jnp.dot(y, wqkv_ref[l, 2], preferred_element_type=jnp.float32) + bqkv_ref[l, 2]
        # sublane-aligned fold (B*S, D) -> (B, S, D); S == 8 so this matches the tiling.
        q3 = q.reshape(batch, seq, D)
        k3 = k.reshape(batch, seq, D)
        v3 = v.reshape(batch, seq, D)

        ctx = jnp.zeros((batch, seq, D), jnp.float32)
        for h in range(num_heads):                            # static; full-width masked math
            m = ((lane >= h * hd) & (lane < (h + 1) * hd)).astype(jnp.float32)
            # masked q => scores are exactly q_h @ k_h^T (off-head lanes contribute 0)
            s = jnp.einsum('bqd,bkd->bqk', q3 * m, k3,
                           preferred_element_type=jnp.float32) * inv_sqrt_hd
            s = s - jnp.max(s, axis=-1, keepdims=True)
            p = jnp.exp(s)
            p = p * pl.reciprocal(jnp.sum(p, axis=-1, keepdims=True), approx=True)
            # masked v => contribution lands only in head h's lanes; sum == concat(heads)
            ctx = ctx + jnp.einsum('bqk,bkd->bqd', p, v3 * m,
                                   preferred_element_type=jnp.float32)

        attn = ctx.reshape(batch * seq, D)
        attn = jnp.dot(attn, wo_ref[l], preferred_element_type=jnp.float32) + bo_ref[l]

        h1 = _layernorm(y + attn, g1_ref[l], bn1_ref[l])

        # ---------- feed-forward (Linear -> ReLU -> Linear) ----------
        ff = jnp.maximum(
            jnp.dot(h1, w1_ref[l], preferred_element_type=jnp.float32) + b1_ref[l], 0.0)
        ff = jnp.dot(ff, w2_ref[l], preferred_element_type=jnp.float32) + b2_ref[l]

        y = _layernorm(h1 + ff, g2_ref[l], bn2_ref[l])

    # ---------- decoder: single logit per token ----------
    logits = jnp.dot(y, dec_w_ref[...], preferred_element_type=jnp.float32) + dec_b_ref[...]
    o_ref[...] = logits.astype(o_ref.dtype)                   # (B*S, 1)


# ----------------------------- wrapper -------------------------------------- #

def binary_transformer_forward(x, pe, params):
    # TODO(synk): source forward calls self.encoder(x), which is never defined in the
    # module; treated as identity.
    B, S, D = x.shape
    x2 = x.reshape(B * S, D)                 # fold batch into matmul rows (free in XLA)
    pe2 = jnp.tile(pe[:S], (B, 1))           # (B*S, D) positional rows, batch-major

    kernel = functools.partial(
        fused_forward_kernel,
        num_layers=NUM_LAYERS, num_heads=NUM_HEADS,
        batch=B, seq=S, scale=math.sqrt(MODEL_SIZE))

    logits = pl.pallas_call(
        kernel,
        out_shape=jax.ShapeDtypeStruct((B * S, 1), jnp.float32),
    )(x2, pe2,
      params['wqkv'], params['bqkv'], params['wo'], params['bo'],
      params['g1'], params['bn1'], params['w1'], params['b1'],
      params['w2'], params['b2'], params['g2'], params['bn2'],
      params['dec_w'], params['dec_b'])
    return logits.reshape(B, S, 1)


# ----------------------------- params / PE ---------------------------------- #

def make_positional_encodings(max_len, d):
    position = jnp.arange(max_len, dtype=jnp.float32)[:, None]
    # Reproduces the source formula as written (exp applied before the scale).
    modifier = jnp.exp(jnp.arange(0, d, 2, dtype=jnp.float32)) * (-math.log(10000.0) / d)
    pe = jnp.zeros((max_len, d), dtype=jnp.float32)
    pe = pe.at[:, 0::2].set(jnp.sin(position * modifier))
    pe = pe.at[:, 1::2].set(jnp.cos(position * modifier))
    return pe


def init_params(key, d, hidden, nlayers):
    def nrm(k, shape, scale=0.05):
        return jax.random.normal(k, shape, dtype=jnp.float32) * scale

    wqkv, bqkv, wo, bo = [], [], [], []
    g1, bn1, w1, b1, w2, b2, g2, bn2 = [], [], [], [], [], [], [], []
    k = key
    for _ in range(nlayers):
        k, k1, k2, k3, k4 = jax.random.split(k, 5)
        wqkv.append(nrm(k1, (3, d, d)))                       # packed in_proj (Q, K, V)
        bqkv.append(jnp.zeros((3, 1, d), jnp.float32))
        wo.append(nrm(k2, (d, d)))                            # out_proj
        bo.append(jnp.zeros((1, d), jnp.float32))
        g1.append(jnp.ones((1, d), jnp.float32))              # LayerNorm1
        bn1.append(jnp.zeros((1, d), jnp.float32))
        w1.append(nrm(k3, (d, hidden)))                       # FFN linear1
        b1.append(jnp.zeros((1, hidden), jnp.float32))
        w2.append(nrm(k4, (hidden, d)))                       # FFN linear2
        b2.append(jnp.zeros((1, d), jnp.float32))
        g2.append(jnp.ones((1, d), jnp.float32))              # LayerNorm2
        bn2.append(jnp.zeros((1, d), jnp.float32))

    k, kd = jax.random.split(k)
    return dict(
        wqkv=jnp.stack(wqkv), bqkv=jnp.stack(bqkv),
        wo=jnp.stack(wo), bo=jnp.stack(bo),
        g1=jnp.stack(g1), bn1=jnp.stack(bn1),
        w1=jnp.stack(w1), b1=jnp.stack(b1),
        w2=jnp.stack(w2), b2=jnp.stack(b2),
        g2=jnp.stack(g2), bn2=jnp.stack(bn2),
        dec_w=nrm(kd, (d, 1)),
        dec_b=jnp.zeros((1, 1), jnp.float32),
    )


if __name__ == "__main__":
    key = jax.random.PRNGKey(0)
    kx, kp = jax.random.split(key)
    x = jax.random.normal(kx, (BATCH, SEQ, MODEL_SIZE), dtype=jnp.float32)

    pe = make_positional_encodings(1000, MODEL_SIZE)
    params = init_params(kp, MODEL_SIZE, HIDDEN_SIZE, NUM_LAYERS)

    out = binary_transformer_forward(x, pe, params)
    out = jax.block_until_ready(out)
    assert out.shape == (BATCH, SEQ, 1), out.shape
    assert bool(jnp.all(jnp.isfinite(out)))
    print("KERNEL_OK")
</pallas_src>

<mosaic_0001>
module attributes {stable_mosaic.version = 11 : i64} {
  func.func @fused_forward_kernel(%arg0: memref<16x32xf32, #tpu.memory_space<vmem>>, %arg1: memref<16x32xf32, #tpu.memory_space<vmem>>, %arg2: memref<2x3x32x32xf32, #tpu.memory_space<vmem>>, %arg3: memref<2x3x1x32xf32, #tpu.memory_space<vmem>>, %arg4: memref<2x32x32xf32, #tpu.memory_space<vmem>>, %arg5: memref<2x1x32xf32, #tpu.memory_space<vmem>>, %arg6: memref<2x1x32xf32, #tpu.memory_space<vmem>>, %arg7: memref<2x1x32xf32, #tpu.memory_space<vmem>>, %arg8: memref<2x32x64xf32, #tpu.memory_space<vmem>>, %arg9: memref<2x1x64xf32, #tpu.memory_space<vmem>>, %arg10: memref<2x64x32xf32, #tpu.memory_space<vmem>>, %arg11: memref<2x1x32xf32, #tpu.memory_space<vmem>>, %arg12: memref<2x1x32xf32, #tpu.memory_space<vmem>>, %arg13: memref<2x1x32xf32, #tpu.memory_space<vmem>>, %arg14: memref<32x1xf32, #tpu.memory_space<vmem>>, %arg15: memref<1x1xf32, #tpu.memory_space<vmem>>, %arg16: memref<16x1xf32, #tpu.memory_space<vmem>>) attributes {dimension_semantics = [], scalar_prefetch = 0 : i64, scratch_operands = 0 : i64, tpu.core_type = #tpu.core_type<tc>} {
    %c0 = arith.constant 0 : index
    %c0_0 = arith.constant 0 : index
    %0 = vector.load %arg0[%c0, %c0_0] : memref<16x32xf32, #tpu.memory_space<vmem>>, vector<16x32xf32>
    %cst = arith.constant 5.65685415 : f32
    %1 = vector.broadcast %cst : f32 to vector<16x32xf32>
    %2 = arith.mulf %0, %1 : vector<16x32xf32>
    %c0_1 = arith.constant 0 : index
    %c0_2 = arith.constant 0 : index
    %3 = vector.load %arg1[%c0_1, %c0_2] : memref<16x32xf32, #tpu.memory_space<vmem>>, vector<16x32xf32>
    %4 = arith.addf %2, %3 : vector<16x32xf32>
    %5 = tpu.iota {dimensions = array<i32: 2>} : vector<1x1x32xi32>
    %c0_3 = arith.constant 0 : index
    %c0_4 = arith.constant 0 : index
    %c0_5 = arith.constant 0 : index
    %c0_6 = arith.constant 0 : index
    %6 = vector.load %arg2[%c0_3, %c0_4, %c0_5, %c0_6] : memref<2x3x32x32xf32, #tpu.memory_space<vmem>>, vector<1x1x32x32xf32>
    %7 = vector.shape_cast %6 : vector<1x1x32x32xf32> to vector<32x32xf32>
    %cst_7 = arith.constant dense<0.000000e+00> : vector<16x32xf32>
    %8 = tpu.matmul %4, %7, %cst_7 {dimension_numbers = #tpu.dot_dimension_numbers<[1], [0], [0], [1], [0, 0, 1, 1], [], []>} : vector<16x32xf32>, vector<32x32xf32>, vector<16x32xf32> -> vector<16x32xf32>
    %c0_8 = arith.constant 0 : index
    %c0_9 = arith.constant 0 : index
    %c0_10 = arith.constant 0 : index
    %c0_11 = arith.constant 0 : index
    %9 = vector.load %arg3[%c0_8, %c0_9, %c0_10, %c0_11] : memref<2x3x1x32xf32, #tpu.memory_space<vmem>>, vector<1x1x1x32xf32>
    %10 = vector.shape_cast %9 : vector<1x1x1x32xf32> to vector<1x32xf32>
    %11 = vector.broadcast %10 : vector<1x32xf32> to vector<16x32xf32>
    %12 = arith.addf %8, %11 : vector<16x32xf32>
    %c0_12 = arith.constant 0 : index
    %c1 = arith.constant 1 : index
    %c0_13 = arith.constant 0 : index
    %c0_14 = arith.constant 0 : index
    %13 = vector.load %arg2[%c0_12, %c1, %c0_13, %c0_14] : memref<2x3x32x32xf32, #tpu.memory_space<vmem>>, vector<1x1x32x32xf32>
    %14 = vector.shape_cast %13 : vector<1x1x32x32xf32> to vector<32x32xf32>
    %cst_15 = arith.constant dense<0.000000e+00> : vector<16x32xf32>
    %15 = tpu.matmul %4, %14, %cst_15 {dimension_numbers = #tpu.dot_dimension_numbers<[1], [0], [0], [1], [0, 0, 1, 1], [], []>} : vector<16x32xf32>, vector<32x32xf32>, vector<16x32xf32> -> vector<16x32xf32>
    %c0_16 = arith.constant 0 : index
    %c1_17 = arith.constant 1 : index
    %c0_18 = arith.constant 0 : index
    %c0_19 = arith.constant 0 : index
    %16 = vector.load %arg3[%c0_16, %c1_17, %c0_18, %c0_19] : memref<2x3x1x32xf32, #tpu.memory_space<vmem>>, vector<1x1x1x32xf32>
    %17 = vector.shape_cast %16 : vector<1x1x1x32xf32> to vector<1x32xf32>
    %18 = vector.broadcast %17 : vector<1x32xf32> to vector<16x32xf32>
    %19 = arith.addf %15, %18 : vector<16x32xf32>
    %c0_20 = arith.constant 0 : index
    %c2 = arith.constant 2 : index
    %c0_21 = arith.constant 0 : index
    %c0_22 = arith.constant 0 : index
    %20 = vector.load %arg2[%c0_20, %c2, %c0_21, %c0_22] : memref<2x3x32x32xf32, #tpu.memory_space<vmem>>, vector<1x1x32x32xf32>
    %21 = vector.shape_cast %20 : vector<1x1x32x32xf32> to vector<32x32xf32>
    %cst_23 = arith.constant dense<0.000000e+00> : vector<16x32xf32>
    %22 = tpu.matmul %4, %21, %cst_23 {dimension_numbers = #tpu.dot_dimension_numbers<[1], [0], [0], [1], [0, 0, 1, 1], [], []>} : vector<16x32xf32>, vector<32x32xf32>, vector<16x32xf32> -> vector<16x32xf32>
    %c0_24 = arith.constant 0 : index
    %c2_25 = arith.constant 2 : index
    %c0_26 = arith.constant 0 : index
    %c0_27 = arith.constant 0 : index
    %23 = vector.load %arg3[%c0_24, %c2_25, %c0_26, %c0_27] : memref<2x3x1x32xf32, #tpu.memory_space<vmem>>, vector<1x1x1x32xf32>
    %24 = vector.shape_cast %23 : vector<1x1x1x32xf32> to vector<1x32xf32>
    %25 = vector.broadcast %24 : vector<1x32xf32> to vector<16x32xf32>
    %26 = arith.addf %22, %25 : vector<16x32xf32>
    %27 = vector.shape_cast %12 : vector<16x32xf32> to vector<2x8x32xf32>
    %28 = vector.shape_cast %19 : vector<16x32xf32> to vector<2x8x32xf32>
    %29 = vector.shape_cast %26 : vector<16x32xf32> to vector<2x8x32xf32>
    %cst_28 = arith.constant 0.000000e+00 : f32
    %30 = vector.broadcast %cst_28 : f32 to vector<2x8x32xf32>
    %c0_i32 = arith.constant 0 : i32
    %31 = vector.broadcast %c0_i32 : i32 to vector<1x1x32xi32>
    %32 = arith.cmpi sge, %5, %31 : vector<1x1x32xi32>
    %c8_i32 = arith.constant 8 : i32
    %33 = vector.broadcast %c8_i32 : i32 to vector<1x1x32xi32>
    %34 = arith.cmpi slt, %5, %33 : vector<1x1x32xi32>
    %35 = arith.andi %32, %34 : vector<1x1x32xi1>
    %36 = arith.extui %35 : vector<1x1x32xi1> to vector<1x1x32xi32>
    %37 = arith.sitofp %36 : vector<1x1x32xi32> to vector<1x1x32xf32>
    %38 = vector.broadcast %37 : vector<1x1x32xf32> to vector<2x8x32xf32>
    %39 = arith.mulf %27, %38 : vector<2x8x32xf32>
    "tpu.trace_start"() <{level = 10 : i32, message = "bqd,bkd->bqk"}> : () -> ()
    %cst_29 = arith.constant dense<0.000000e+00> : vector<2x8x8xf32>
    %40 = tpu.matmul %39, %28, %cst_29 {dimension_numbers = #tpu.dot_dimension_numbers<[2], [2], [1], [1], [0, 0, 0, 1, 1, 1], [0], [0]>} : vector<2x8x32xf32>, vector<2x8x32xf32>, vector<2x8x8xf32> -> vector<2x8x8xf32>
    "tpu.trace_stop"() : () -> ()
    %cst_30 = arith.constant 0.353553385 : f32
    %41 = vector.broadcast %cst_30 : f32 to vector<2x8x8xf32>
    %42 = arith.mulf %40, %41 : vector<2x8x8xf32>
    %cst_31 = arith.constant dense<0xFF800000> : vector<2x8xf32>
    %43 = vector.multi_reduction <maximumf>, %42, %cst_31 [2] : vector<2x8x8xf32> to vector<2x8xf32>
    %44 = vector.shape_cast %43 : vector<2x8xf32> to vector<2x8x1xf32>
    %45 = vector.broadcast %44 : vector<2x8x1xf32> to vector<2x8x8xf32>
    %46 = arith.subf %42, %45 : vector<2x8x8xf32>
    %47 = math.exp %46 : vector<2x8x8xf32>
    %cst_32 = arith.constant dense<0.000000e+00> : vector<2x8xf32>
    %48 = vector.multi_reduction <add>, %47, %cst_32 [2] : vector<2x8x8xf32> to vector<2x8xf32>
    %49 = vector.shape_cast %48 : vector<2x8xf32> to vector<2x8x1xf32>
    %50 = tpu.reciprocal %49 {approx = true} : vector<2x8x1xf32> -> vector<2x8x1xf32>
    %51 = vector.broadcast %50 : vector<2x8x1xf32> to vector<2x8x8xf32>
    %52 = arith.mulf %47, %51 : vector<2x8x8xf32>
    %53 = vector.broadcast %37 : vector<1x1x32xf32> to vector<2x8x32xf32>
    %54 = arith.mulf %29, %53 : vector<2x8x32xf32>
    "tpu.trace_start"() <{level = 10 : i32, message = "bqk,bkd->bqd"}> : () -> ()
    %cst_33 = arith.constant dense<0.000000e+00> : vector<2x8x32xf32>
    %55 = tpu.matmul %52, %54, %cst_33 {dimension_numbers = #tpu.dot_dimension_numbers<[2], [1], [1], [2], [0, 0, 0, 1, 1, 2], [0], [0]>} : vector<2x8x8xf32>, vector<2x8x32xf32>, vector<2x8x32xf32> -> vector<2x8x32xf32>
    "tpu.trace_stop"() : () -> ()
    %56 = arith.addf %30, %55 : vector<2x8x32xf32>
    %c8_i32_34 = arith.constant 8 : i32
    %57 = vector.broadcast %c8_i32_34 : i32 to vector<1x1x32xi32>
    %58 = arith.cmpi sge, %5, %57 : vector<1x1x32xi32>
    %c16_i32 = arith.constant 16 : i32
    %59 = vector.broadcast %c16_i32 : i32 to vector<1x1x32xi32>
    %60 = arith.cmpi slt, %5, %59 : vector<1x1x32xi32>
    %61 = arith.andi %58, %60 : vector<1x1x32xi1>
    %62 = arith.extui %61 : vector<1x1x32xi1> to vector<1x1x32xi32>
    %63 = arith.sitofp %62 : vector<1x1x32xi32> to vector<1x1x32xf32>
    %64 = vector.broadcast %63 : vector<1x1x32xf32> to vector<2x8x32xf32>
    %65 = arith.mulf %27, %64 : vector<2x8x32xf32>
    "tpu.trace_start"() <{level = 10 : i32, message = "bqd,bkd->bqk"}> : () -> ()
    %cst_35 = arith.constant dense<0.000000e+00> : vector<2x8x8xf32>
    %66 = tpu.matmul %65, %28, %cst_35 {dimension_numbers = #tpu.dot_dimension_numbers<[2], [2], [1], [1], [0, 0, 0, 1, 1, 1], [0], [0]>} : vector<2x8x32xf32>, vector<2x8x32xf32>, vector<2x8x8xf32> -> vector<2x8x8xf32>
    "tpu.trace_stop"() : () -> ()
    %cst_36 = arith.constant 0.353553385 : f32
    %67 = vector.broadcast %cst_36 : f32 to vector<2x8x8xf32>
    %68 = arith.mulf %66, %67 : vector<2x8x8xf32>
    %cst_37 = arith.constant dense<0xFF800000> : vector<2x8xf32>
    %69 = vector.multi_reduction <maximumf>, %68, %cst_37 [2] : vector<2x8x8xf32> to vector<2x8xf32>
    %70 = vector.shape_cast %69 : vector<2x8xf32> to vector<2x8x1xf32>
    %71 = vector.broadcast %70 : vector<2x8x1xf32> to vector<2x8x8xf32>
    %72 = arith.subf %68, %71 : vector<2x8x8xf32>
    %73 = math.exp %72 : vector<2x8x8xf32>
    %cst_38 = arith.constant dense<0.000000e+00> : vector<2x8xf32>
    %74 = vector.multi_reduction <add>, %73, %cst_38 [2] : vector<2x8x8xf32> to vector<2x8xf32>
    %75 = vector.shape_cast %74 : vector<2x8xf32> to vector<2x8x1xf32>
    %76 = tpu.reciprocal %75 {approx = true} : vector<2x8x1xf32> -> vector<2x8x1xf32>
    %77 = vector.broadcast %76 : vector<2x8x1xf32> to vector<2x8x8xf32>
    %78 = arith.mulf %73, %77 : vector<2x8x8xf32>
    %79 = vector.broadcast %63 : vector<1x1x32xf32> to vector<2x8x32xf32>
    %80 = arith.mulf %29, %79 : vector<2x8x32xf32>
    "tpu.trace_start"() <{level = 10 : i32, message = "bqk,bkd->bqd"}> : () -> ()
    %cst_39 = arith.constant dense<0.000000e+00> : vector<2x8x32xf32>
    %81 = tpu.matmul %78, %80, %cst_39 {dimension_numbers = #tpu.dot_dimension_numbers<[2], [1], [1], [2], [0, 0, 0, 1, 1, 2], [0], [0]>} : vector<2x8x8xf32>, vector<2x8x32xf32>, vector<2x8x32xf32> -> vector<2x8x32xf32>
    "tpu.trace_stop"() : () -> ()
    %82 = arith.addf %56, %81 : vector<2x8x32xf32>
    %c16_i32_40 = arith.constant 16 : i32
    %83 = vector.broadcast %c16_i32_40 : i32 to vector<1x1x32xi32>
    %84 = arith.cmpi sge, %5, %83 : vector<1x1x32xi32>
    %c24_i32 = arith.constant 24 : i32
    %85 = vector.broadcast %c24_i32 : i32 to vector<1x1x32xi32>
    %86 = arith.cmpi slt, %5, %85 : vector<1x1x32xi32>
    %87 = arith.andi %84, %86 : vector<1x1x32xi1>
    %88 = arith.extui %87 : vector<1x1x32xi1> to vector<1x1x32xi32>
    %89 = arith.sitofp %88 : vector<1x1x32xi32> to vector<1x1x32xf32>
    %90 = vector.broadcast %89 : vector<1x1x32xf32> to vector<2x8x32xf32>
    %91 = arith.mulf %27, %90 : vector<2x8x32xf32>
    "tpu.trace_start"() <{level = 10 : i32, message = "bqd,bkd->bqk"}> : () -> ()
    %cst_41 = arith.constant dense<0.000000e+00> : vector<2x8x8xf32>
    %92 = tpu.matmul %91, %28, %cst_41 {dimension_numbers = #tpu.dot_dimension_numbers<[2], [2], [1], [1], [0, 0, 0, 1, 1, 1], [0], [0]>} : vector<2x8x32xf32>, vector<2x8x32xf32>, vector<2x8x8xf32> -> vector<2x8x8xf32>
    "tpu.trace_stop"() : () -> ()
    %cst_42 = arith.constant 0.353553385 : f32
    %93 = vector.broadcast %cst_42 : f32 to vector<2x8x8xf32>
    %94 = arith.mulf %92, %93 : vector<2x8x8xf32>
    %cst_43 = arith.constant dense<0xFF800000> : vector<2x8xf32>
    %95 = vector.multi_reduction <maximumf>, %94, %cst_43 [2] : vector<2x8x8xf32> to vector<2x8xf32>
    %96 = vector.shape_cast %95 : vector<2x8xf32> to vector<2x8x1xf32>
    %97 = vector.broadcast %96 : vector<2x8x1xf32> to vector<2x8x8xf32>
    %98 = arith.subf %94, %97 : vector<2x8x8xf32>
    %99 = math.exp %98 : vector<2x8x8xf32>
    %cst_44 = arith.constant dense<0.000000e+00> : vector<2x8xf32>
    %100 = vector.multi_reduction <add>, %99, %cst_44 [2] : vector<2x8x8xf32> to vector<2x8xf32>
    %101 = vector.shape_cast %100 : vector<2x8xf32> to vector<2x8x1xf32>
    %102 = tpu.reciprocal %101 {approx = true} : vector<2x8x1xf32> -> vector<2x8x1xf32>
    %103 = vector.broadcast %102 : vector<2x8x1xf32> to vector<2x8x8xf32>
    %104 = arith.mulf %99, %103 : vector<2x8x8xf32>
    %105 = vector.broadcast %89 : vector<1x1x32xf32> to vector<2x8x32xf32>
    %106 = arith.mulf %29, %105 : vector<2x8x32xf32>
    "tpu.trace_start"() <{level = 10 : i32, message = "bqk,bkd->bqd"}> : () -> ()
    %cst_45 = arith.constant dense<0.000000e+00> : vector<2x8x32xf32>
    %107 = tpu.matmul %104, %106, %cst_45 {dimension_numbers = #tpu.dot_dimension_numbers<[2], [1], [1], [2], [0, 0, 0, 1, 1, 2], [0], [0]>} : vector<2x8x8xf32>, vector<2x8x32xf32>, vector<2x8x32xf32> -> vector<2x8x32xf32>
    "tpu.trace_stop"() : () -> ()
    %108 = arith.addf %82, %107 : vector<2x8x32xf32>
    %c24_i32_46 = arith.constant 24 : i32
    %109 = vector.broadcast %c24_i32_46 : i32 to vector<1x1x32xi32>
    %110 = arith.cmpi sge, %5, %109 : vector<1x1x32xi32>
    %c32_i32 = arith.constant 32 : i32
    %111 = vector.broadcast %c32_i32 : i32 to vector<1x1x32xi32>
    %112 = arith.cmpi slt, %5, %111 : vector<1x1x32xi32>
    %113 = arith.andi %110, %112 : vector<1x1x32xi1>
    %114 = arith.extui %113 : vector<1x1x32xi1> to vector<1x1x32xi32>
    %115 = arith.sitofp %114 : vector<1x1x32xi32> to vector<1x1x32xf32>
    %116 = vector.broadcast %115 : vector<1x1x32xf32> to vector<2x8x32xf32>
    %117 = arith.mulf %27, %116 : vector<2x8x32xf32>
    "tpu.trace_start"() <{level = 10 : i32, message = "bqd,bkd->bqk"}> : () -> ()
    %cst_47 = arith.constant dense<0.000000e+00> : vector<2x8x8xf32>
    %118 = tpu.matmul %117, %28, %cst_47 {dimension_numbers = #tpu.dot_dimension_numbers<[2], [2], [1], [1], [0, 0, 0, 1, 1, 1], [0], [0]>} : vector<2x8x32xf32>, vector<2x8x32xf32>, vector<2x8x8xf32> -> vector<2x8x8xf32>
    "tpu.trace_stop"() : () -> ()
    %cst_48 = arith.constant 0.353553385 : f32
    %119 = vector.broadcast %cst_48 : f32 to vector<2x8x8xf32>
    %120 = arith.mulf %118, %119 : vector<2x8x8xf32>
    %cst_49 = arith.constant dense<0xFF800000> : vector<2x8xf32>
    %121 = vector.multi_reduction <maximumf>, %120, %cst_49 [2] : vector<2x8x8xf32> to vector<2x8xf32>
    %122 = vector.shape_cast %121 : vector<2x8xf32> to vector<2x8x1xf32>
    %123 = vector.broadcast %122 : vector<2x8x1xf32> to vector<2x8x8xf32>
    %124 = arith.subf %120, %123 : vector<2x8x8xf32>
    %125 = math.exp %124 : vector<2x8x8xf32>
    %cst_50 = arith.constant dense<0.000000e+00> : vector<2x8xf32>
    %126 = vector.multi_reduction <add>, %125, %cst_50 [2] : vector<2x8x8xf32> to vector<2x8xf32>
    %127 = vector.shape_cast %126 : vector<2x8xf32> to vector<2x8x1xf32>
    %128 = tpu.reciprocal %127 {approx = true} : vector<2x8x1xf32> -> vector<2x8x1xf32>
    %129 = vector.broadcast %128 : vector<2x8x1xf32> to vector<2x8x8xf32>
    %130 = arith.mulf %125, %129 : vector<2x8x8xf32>
    %131 = vector.broadcast %115 : vector<1x1x32xf32> to vector<2x8x32xf32>
    %132 = arith.mulf %29, %131 : vector<2x8x32xf32>
    "tpu.trace_start"() <{level = 10 : i32, message = "bqk,bkd->bqd"}> : () -> ()
    %cst_51 = arith.constant dense<0.000000e+00> : vector<2x8x32xf32>
    %133 = tpu.matmul %130, %132, %cst_51 {dimension_numbers = #tpu.dot_dimension_numbers<[2], [1], [1], [2], [0, 0, 0, 1, 1, 2], [0], [0]>} : vector<2x8x8xf32>, vector<2x8x32xf32>, vector<2x8x32xf32> -> vector<2x8x32xf32>
    "tpu.trace_stop"() : () -> ()
    %134 = arith.addf %108, %133 : vector<2x8x32xf32>
    %135 = vector.shape_cast %134 : vector<2x8x32xf32> to vector<16x32xf32>
    %c0_52 = arith.constant 0 : index
    %c0_53 = arith.constant 0 : index
    %c0_54 = arith.constant 0 : index
    %136 = vector.load %arg4[%c0_52, %c0_53, %c0_54] : memref<2x32x32xf32, #tpu.memory_space<vmem>>, vector<1x32x32xf32>
    %137 = vector.shape_cast %136 : vector<1x32x32xf32> to vector<32x32xf32>
    %cst_55 = arith.constant dense<0.000000e+00> : vector<16x32xf32>
    %138 = tpu.matmul %135, %137, %cst_55 {dimension_numbers = #tpu.dot_dimension_numbers<[1], [0], [0], [1], [0, 0, 1, 1], [], []>} : vector<16x32xf32>, vector<32x32xf32>, vector<16x32xf32> -> vector<16x32xf32>
    %c0_56 = arith.constant 0 : index
    %c0_57 = arith.constant 0 : index
    %c0_58 = arith.constant 0 : index
    %139 = vector.load %arg5[%c0_56, %c0_57, %c0_58] : memref<2x1x32xf32, #tpu.memory_space<vmem>>, vector<1x1x32xf32>
    %140 = vector.shape_cast %139 : vector<1x1x32xf32> to vector<1x32xf32>
    %141 = vector.broadcast %140 : vector<1x32xf32> to vector<16x32xf32>
    %142 = arith.addf %138, %141 : vector<16x32xf32>
    %143 = arith.addf %4, %142 : vector<16x32xf32>
    %c0_59 = arith.constant 0 : index
    %c0_60 = arith.constant 0 : index
    %c0_61 = arith.constant 0 : index
    %144 = vector.load %arg6[%c0_59, %c0_60, %c0_61] : memref<2x1x32xf32, #tpu.memory_space<vmem>>, vector<1x1x32xf32>
    %145 = vector.shape_cast %144 : vector<1x1x32xf32> to vector<1x32xf32>
    %c0_62 = arith.constant 0 : index
    %c0_63 = arith.constant 0 : index
    %c0_64 = arith.constant 0 : index
    %146 = vector.load %arg7[%c0_62, %c0_63, %c0_64] : memref<2x1x32xf32, #tpu.memory_space<vmem>>, vector<1x1x32xf32>
    %147 = vector.shape_cast %146 : vector<1x1x32xf32> to vector<1x32xf32>
    %cst_65 = arith.constant dense<0.000000e+00> : vector<16xf32>
    %148 = vector.multi_reduction <add>, %143, %cst_65 [1] : vector<16x32xf32> to vector<16xf32>
    %149 = vector.shape_cast %148 : vector<16xf32> to vector<16x1xf32>
    %cst_66 = arith.constant 3.200000e+01 : f32
    %150 = vector.broadcast %cst_66 : f32 to vector<16x1xf32>
    %151 = arith.divf %149, %150 : vector<16x1xf32>
    %152 = vector.broadcast %151 : vector<16x1xf32> to vector<16x32xf32>
    %153 = arith.subf %143, %152 : vector<16x32xf32>
    %154 = arith.mulf %153, %153 : vector<16x32xf32>
    %cst_67 = arith.constant dense<0.000000e+00> : vector<16xf32>
    %155 = vector.multi_reduction <add>, %154, %cst_67 [1] : vector<16x32xf32> to vector<16xf32>
    %156 = vector.shape_cast %155 : vector<16xf32> to vector<16x1xf32>
    %cst_68 = arith.constant 3.200000e+01 : f32
    %157 = vector.broadcast %cst_68 : f32 to vector<16x1xf32>
    %158 = arith.divf %156, %157 : vector<16x1xf32>
    %159 = vector.broadcast %151 : vector<16x1xf32> to vector<16x32xf32>
    %160 = arith.subf %143, %159 : vector<16x32xf32>
    %cst_69 = arith.constant 9.99999974E-6 : f32
    %161 = vector.broadcast %cst_69 : f32 to vector<16x1xf32>
    %162 = arith.addf %158, %161 : vector<16x1xf32>
    %163 = math.rsqrt %162 : vector<16x1xf32>
    %164 = vector.broadcast %163 : vector<16x1xf32> to vector<16x32xf32>
    %165 = arith.mulf %160, %164 : vector<16x32xf32>
    %166 = vector.broadcast %145 : vector<1x32xf32> to vector<16x32xf32>
    %167 = arith.mulf %165, %166 : vector<16x32xf32>
    %168 = vector.broadcast %147 : vector<1x32xf32> to vector<16x32xf32>
    %169 = arith.addf %167, %168 : vector<16x32xf32>
    %c0_70 = arith.constant 0 : index
    %c0_71 = arith.constant 0 : index
    %c0_72 = arith.constant 0 : index
    %170 = vector.load %arg8[%c0_70, %c0_71, %c0_72] : memref<2x32x64xf32, #tpu.memory_space<vmem>>, vector<1x32x64xf32>
    %171 = vector.shape_cast %170 : vector<1x32x64xf32> to vector<32x64xf32>
    %cst_73 = arith.constant dense<0.000000e+00> : vector<16x64xf32>
    %172 = tpu.matmul %169, %171, %cst_73 {dimension_numbers = #tpu.dot_dimension_numbers<[1], [0], [0], [1], [0, 0, 1, 1], [], []>} : vector<16x32xf32>, vector<32x64xf32>, vector<16x64xf32> -> vector<16x64xf32>
    %c0_74 = arith.constant 0 : index
    %c0_75 = arith.constant 0 : index
    %c0_76 = arith.constant 0 : index
    %173 = vector.load %arg9[%c0_74, %c0_75, %c0_76] : memref<2x1x64xf32, #tpu.memory_space<vmem>>, vector<1x1x64xf32>
    %174 = vector.shape_cast %173 : vector<1x1x64xf32> to vector<1x64xf32>
    %175 = vector.broadcast %174 : vector<1x64xf32> to vector<16x64xf32>
    %176 = arith.addf %172, %175 : vector<16x64xf32>
    %cst_77 = arith.constant 0.000000e+00 : f32
    %177 = vector.broadcast %cst_77 : f32 to vector<16x64xf32>
    %178 = arith.maximumf %176, %177 : vector<16x64xf32>
    %c0_78 = arith.constant 0 : index
    %c0_79 = arith.constant 0 : index
    %c0_80 = arith.constant 0 : index
    %179 = vector.load %arg10[%c0_78, %c0_79, %c0_80] : memref<2x64x32xf32, #tpu.memory_space<vmem>>, vector<1x64x32xf32>
    %180 = vector.shape_cast %179 : vector<1x64x32xf32> to vector<64x32xf32>
    %cst_81 = arith.constant dense<0.000000e+00> : vector<16x32xf32>
    %181 = tpu.matmul %178, %180, %cst_81 {dimension_numbers = #tpu.dot_dimension_numbers<[1], [0], [0], [1], [0, 0, 1, 1], [], []>} : vector<16x64xf32>, vector<64x32xf32>, vector<16x32xf32> -> vector<16x32xf32>
    %c0_82 = arith.constant 0 : index
    %c0_83 = arith.constant 0 : index
    %c0_84 = arith.constant 0 : index
    %182 = vector.load %arg11[%c0_82, %c0_83, %c0_84] : memref<2x1x32xf32, #tpu.memory_space<vmem>>, vector<1x1x32xf32>
    %183 = vector.shape_cast %182 : vector<1x1x32xf32> to vector<1x32xf32>
    %184 = vector.broadcast %183 : vector<1x32xf32> to vector<16x32xf32>
    %185 = arith.addf %181, %184 : vector<16x32xf32>
    %186 = arith.addf %169, %185 : vector<16x32xf32>
    %c0_85 = arith.constant 0 : index
    %c0_86 = arith.constant 0 : index
    %c0_87 = arith.constant 0 : index
    %187 = vector.load %arg12[%c0_85, %c0_86, %c0_87] : memref<2x1x32xf32, #tpu.memory_space<vmem>>, vector<1x1x32xf32>
    %188 = vector.shape_cast %187 : vector<1x1x32xf32> to vector<1x32xf32>
    %c0_88 = arith.constant 0 : index
    %c0_89 = arith.constant 0 : index
    %c0_90 = arith.constant 0 : index
    %189 = vector.load %arg13[%c0_88, %c0_89, %c0_90] : memref<2x1x32xf32, #tpu.memory_space<vmem>>, vector<1x1x32xf32>
    %190 = vector.shape_cast %189 : vector<1x1x32xf32> to vector<1x32xf32>
    %cst_91 = arith.constant dense<0.000000e+00> : vector<16xf32>
    %191 = vector.multi_reduction <add>, %186, %cst_91 [1] : vector<16x32xf32> to vector<16xf32>
    %192 = vector.shape_cast %191 : vector<16xf32> to vector<16x1xf32>
    %cst_92 = arith.constant 3.200000e+01 : f32
    %193 = vector.broadcast %cst_92 : f32 to vector<16x1xf32>
    %194 = arith.divf %192, %193 : vector<16x1xf32>
    %195 = vector.broadcast %194 : vector<16x1xf32> to vector<16x32xf32>
    %196 = arith.subf %186, %195 : vector<16x32xf32>
    %197 = arith.mulf %196, %196 : vector<16x32xf32>
    %cst_93 = arith.constant dense<0.000000e+00> : vector<16xf32>
    %198 = vector.multi_reduction <add>, %197, %cst_93 [1] : vector<16x32xf32> to vector<16xf32>
    %199 = vector.shape_cast %198 : vector<16xf32> to vector<16x1xf32>
    %cst_94 = arith.constant 3.200000e+01 : f32
    %200 = vector.broadcast %cst_94 : f32 to vector<16x1xf32>
    %201 = arith.divf %199, %200 : vector<16x1xf32>
    %202 = vector.broadcast %194 : vector<16x1xf32> to vector<16x32xf32>
    %203 = arith.subf %186, %202 : vector<16x32xf32>
    %cst_95 = arith.constant 9.99999974E-6 : f32
    %204 = vector.broadcast %cst_95 : f32 to vector<16x1xf32>
    %205 = arith.addf %201, %204 : vector<16x1xf32>
    %206 = math.rsqrt %205 : vector<16x1xf32>
    %207 = vector.broadcast %206 : vector<16x1xf32> to vector<16x32xf32>
    %208 = arith.mulf %203, %207 : vector<16x32xf32>
    %209 = vector.broadcast %188 : vector<1x32xf32> to vector<16x32xf32>
    %210 = arith.mulf %208, %209 : vector<16x32xf32>
    %211 = vector.broadcast %190 : vector<1x32xf32> to vector<16x32xf32>
    %212 = arith.addf %210, %211 : vector<16x32xf32>
    %c1_96 = arith.constant 1 : index
    %c0_97 = arith.constant 0 : index
    %c0_98 = arith.constant 0 : index
    %c0_99 = arith.constant 0 : index
    %213 = vector.load %arg2[%c1_96, %c0_97, %c0_98, %c0_99] : memref<2x3x32x32xf32, #tpu.memory_space<vmem>>, vector<1x1x32x32xf32>
    %214 = vector.shape_cast %213 : vector<1x1x32x32xf32> to vector<32x32xf32>
    %cst_100 = arith.constant dense<0.000000e+00> : vector<16x32xf32>
    %215 = tpu.matmul %212, %214, %cst_100 {dimension_numbers = #tpu.dot_dimension_numbers<[1], [0], [0], [1], [0, 0, 1, 1], [], []>} : vector<16x32xf32>, vector<32x32xf32>, vector<16x32xf32> -> vector<16x32xf32>
    %c1_101 = arith.constant 1 : index
    %c0_102 = arith.constant 0 : index
    %c0_103 = arith.constant 0 : index
    %c0_104 = arith.constant 0 : index
    %216 = vector.load %arg3[%c1_101, %c0_102, %c0_103, %c0_104] : memref<2x3x1x32xf32, #tpu.memory_space<vmem>>, vector<1x1x1x32xf32>
    %217 = vector.shape_cast %216 : vector<1x1x1x32xf32> to vector<1x32xf32>
    %218 = vector.broadcast %217 : vector<1x32xf32> to vector<16x32xf32>
    %219 = arith.addf %215, %218 : vector<16x32xf32>
    %c1_105 = arith.constant 1 : index
    %c1_106 = arith.constant 1 : index
    %c0_107 = arith.constant 0 : index
    %c0_108 = arith.constant 0 : index
    %220 = vector.load %arg2[%c1_105, %c1_106, %c0_107, %c0_108] : memref<2x3x32x32xf32, #tpu.memory_space<vmem>>, vector<1x1x32x32xf32>
    %221 = vector.shape_cast %220 : vector<1x1x32x32xf32> to vector<32x32xf32>
    %cst_109 = arith.constant dense<0.000000e+00> : vector<16x32xf32>
    %222 = tpu.matmul %212, %221, %cst_109 {dimension_numbers = #tpu.dot_dimension_numbers<[1], [0], [0], [1], [0, 0, 1, 1], [], []>} : vector<16x32xf32>, vector<32x32xf32>, vector<16x32xf32> -> vector<16x32xf32>
    %c1_110 = arith.constant 1 : index
    %c1_111 = arith.constant 1 : index
    %c0_112 = arith.constant 0 : index
    %c0_113 = arith.constant 0 : index
    %223 = vector.load %arg3[%c1_110, %c1_111, %c0_112, %c0_113] : memref<2x3x1x32xf32, #tpu.memory_space<vmem>>, vector<1x1x1x32xf32>
    %224 = vector.shape_cast %223 : vector<1x1x1x32xf32> to vector<1x32xf32>
    %225 = vector.broadcast %224 : vector<1x32xf32> to vector<16x32xf32>
    %226 = arith.addf %222, %225 : vector<16x32xf32>
    %c1_114 = arith.constant 1 : index
    %c2_115 = arith.constant 2 : index
    %c0_116 = arith.constant 0 : index
    %c0_117 = arith.constant 0 : index
    %227 = vector.load %arg2[%c1_114, %c2_115, %c0_116, %c0_117] : memref<2x3x32x32xf32, #tpu.memory_space<vmem>>, vector<1x1x32x32xf32>
    %228 = vector.shape_cast %227 : vector<1x1x32x32xf32> to vector<32x32xf32>
    %cst_118 = arith.constant dense<0.000000e+00> : vector<16x32xf32>
    %229 = tpu.matmul %212, %228, %cst_118 {dimension_numbers = #tpu.dot_dimension_numbers<[1], [0], [0], [1], [0, 0, 1, 1], [], []>} : vector<16x32xf32>, vector<32x32xf32>, vector<16x32xf32> -> vector<16x32xf32>
    %c1_119 = arith.constant 1 : index
    %c2_120 = arith.constant 2 : index
    %c0_121 = arith.constant 0 : index
    %c0_122 = arith.constant 0 : index
    %230 = vector.load %arg3[%c1_119, %c2_120, %c0_121, %c0_122] : memref<2x3x1x32xf32, #tpu.memory_space<vmem>>, vector<1x1x1x32xf32>
    %231 = vector.shape_cast %230 : vector<1x1x1x32xf32> to vector<1x32xf32>
    %232 = vector.broadcast %231 : vector<1x32xf32> to vector<16x32xf32>
    %233 = arith.addf %229, %232 : vector<16x32xf32>
    %234 = vector.shape_cast %219 : vector<16x32xf32> to vector<2x8x32xf32>
    %235 = vector.shape_cast %226 : vector<16x32xf32> to vector<2x8x32xf32>
    %236 = vector.shape_cast %233 : vector<16x32xf32> to vector<2x8x32xf32>
    %cst_123 = arith.constant 0.000000e+00 : f32
    %237 = vector.broadcast %cst_123 : f32 to vector<2x8x32xf32>
    %c0_i32_124 = arith.constant 0 : i32
    %238 = vector.broadcast %c0_i32_124 : i32 to vector<1x1x32xi32>
    %239 = arith.cmpi sge, %5, %238 : vector<1x1x32xi32>
    %c8_i32_125 = arith.constant 8 : i32
    %240 = vector.broadcast %c8_i32_125 : i32 to vector<1x1x32xi32>
    %241 = arith.cmpi slt, %5, %240 : vector<1x1x32xi32>
    %242 = arith.andi %239, %241 : vector<1x1x32xi1>
    %243 = arith.extui %242 : vector<1x1x32xi1> to vector<1x1x32xi32>
    %244 = arith.sitofp %243 : vector<1x1x32xi32> to vector<1x1x32xf32>
    %245 = vector.broadcast %244 : vector<1x1x32xf32> to vector<2x8x32xf32>
    %246 = arith.mulf %234, %245 : vector<2x8x32xf32>
    "tpu.trace_start"() <{level = 10 : i32, message = "bqd,bkd->bqk"}> : () -> ()
    %cst_126 = arith.constant dense<0.000000e+00> : vector<2x8x8xf32>
    %247 = tpu.matmul %246, %235, %cst_126 {dimension_numbers = #tpu.dot_dimension_numbers<[2], [2], [1], [1], [0, 0, 0, 1, 1, 1], [0], [0]>} : vector<2x8x32xf32>, vector<2x8x32xf32>, vector<2x8x8xf32> -> vector<2x8x8xf32>
    "tpu.trace_stop"() : () -> ()
    %cst_127 = arith.constant 0.353553385 : f32
    %248 = vector.broadcast %cst_127 : f32 to vector<2x8x8xf32>
    %249 = arith.mulf %247, %248 : vector<2x8x8xf32>
    %cst_128 = arith.constant dense<0xFF800000> : vector<2x8xf32>
    %250 = vector.multi_reduction <maximumf>, %249, %cst_128 [2] : vector<2x8x8xf32> to vector<2x8xf32>
    %251 = vector.shape_cast %250 : vector<2x8xf32> to vector<2x8x1xf32>
    %252 = vector.broadcast %251 : vector<2x8x1xf32> to vector<2x8x8xf32>
    %253 = arith.subf %249, %252 : vector<2x8x8xf32>
    %254 = math.exp %253 : vector<2x8x8xf32>
    %cst_129 = arith.constant dense<0.000000e+00> : vector<2x8xf32>
    %255 = vector.multi_reduction <add>, %254, %cst_129 [2] : vector<2x8x8xf32> to vector<2x8xf32>
    %256 = vector.shape_cast %255 : vector<2x8xf32> to vector<2x8x1xf32>
    %257 = tpu.reciprocal %256 {approx = true} : vector<2x8x1xf32> -> vector<2x8x1xf32>
    %258 = vector.broadcast %257 : vector<2x8x1xf32> to vector<2x8x8xf32>
    %259 = arith.mulf %254, %258 : vector<2x8x8xf32>
    %260 = vector.broadcast %244 : vector<1x1x32xf32> to vector<2x8x32xf32>
    %261 = arith.mulf %236, %260 : vector<2x8x32xf32>
    "tpu.trace_start"() <{level = 10 : i32, message = "bqk,bkd->bqd"}> : () -> ()
    %cst_130 = arith.constant dense<0.000000e+00> : vector<2x8x32xf32>
    %262 = tpu.matmul %259, %261, %cst_130 {dimension_numbers = #tpu.dot_dimension_numbers<[2], [1], [1], [2], [0, 0, 0, 1, 1, 2], [0], [0]>} : vector<2x8x8xf32>, vector<2x8x32xf32>, vector<2x8x32xf32> -> vector<2x8x32xf32>
    "tpu.trace_stop"() : () -> ()
    %263 = arith.addf %237, %262 : vector<2x8x32xf32>
    %c8_i32_131 = arith.constant 8 : i32
    %264 = vector.broadcast %c8_i32_131 : i32 to vector<1x1x32xi32>
    %265 = arith.cmpi sge, %5, %264 : vector<1x1x32xi32>
    %c16_i32_132 = arith.constant 16 : i32
    %266 = vector.broadcast %c16_i32_132 : i32 to vector<1x1x32xi32>
    %267 = arith.cmpi slt, %5, %266 : vector<1x1x32xi32>
    %268 = arith.andi %265, %267 : vector<1x1x32xi1>
    %269 = arith.extui %268 : vector<1x1x32xi1> to vector<1x1x32xi32>
    %270 = arith.sitofp %269 : vector<1x1x32xi32> to vector<1x1x32xf32>
    %271 = vector.broadcast %270 : vector<1x1x32xf32> to vector<2x8x32xf32>
    %272 = arith.mulf %234, %271 : vector<2x8x32xf32>
    "tpu.trace_start"() <{level = 10 : i32, message = "bqd,bkd->bqk"}> : () -> ()
    %cst_133 = arith.constant dense<0.000000e+00> : vector<2x8x8xf32>
    %273 = tpu.matmul %272, %235, %cst_133 {dimension_numbers = #tpu.dot_dimension_numbers<[2], [2], [1], [1], [0, 0, 0, 1, 1, 1], [0], [0]>} : vector<2x8x32xf32>, vector<2x8x32xf32>, vector<2x8x8xf32> -> vector<2x8x8xf32>
    "tpu.trace_stop"() : () -> ()
    %cst_134 = arith.constant 0.353553385 : f32
    %274 = vector.broadcast %cst_134 : f32 to vector<2x8x8xf32>
    %275 = arith.mulf %273, %274 : vector<2x8x8xf32>
    %cst_135 = arith.constant dense<0xFF800000> : vector<2x8xf32>
    %276 = vector.multi_reduction <maximumf>, %275, %cst_135 [2] : vector<2x8x8xf32> to vector<2x8xf32>
    %277 = vector.shape_cast %276 : vector<2x8xf32> to vector<2x8x1xf32>
    %278 = vector.broadcast %277 : vector<2x8x1xf32> to vector<2x8x8xf32>
    %279 = arith.subf %275, %278 : vector<2x8x8xf32>
    %280 = math.exp %279 : vector<2x8x8xf32>
    %cst_136 = arith.constant dense<0.000000e+00> : vector<2x8xf32>
    %281 = vector.multi_reduction <add>, %280, %cst_136 [2] : vector<2x8x8xf32> to vector<2x8xf32>
    %282 = vector.shape_cast %281 : vector<2x8xf32> to vector<2x8x1xf32>
    %283 = tpu.reciprocal %282 {approx = true} : vector<2x8x1xf32> -> vector<2x8x1xf32>
    %284 = vector.broadcast %283 : vector<2x8x1xf32> to vector<2x8x8xf32>
    %285 = arith.mulf %280, %284 : vector<2x8x8xf32>
    %286 = vector.broadcast %270 : vector<1x1x32xf32> to vector<2x8x32xf32>
    %287 = arith.mulf %236, %286 : vector<2x8x32xf32>
    "tpu.trace_start"() <{level = 10 : i32, message = "bqk,bkd->bqd"}> : () -> ()
    %cst_137 = arith.constant dense<0.000000e+00> : vector<2x8x32xf32>
    %288 = tpu.matmul %285, %287, %cst_137 {dimension_numbers = #tpu.dot_dimension_numbers<[2], [1], [1], [2], [0, 0, 0, 1, 1, 2], [0], [0]>} : vector<2x8x8xf32>, vector<2x8x32xf32>, vector<2x8x32xf32> -> vector<2x8x32xf32>
    "tpu.trace_stop"() : () -> ()
    %289 = arith.addf %263, %288 : vector<2x8x32xf32>
    %c16_i32_138 = arith.constant 16 : i32
    %290 = vector.broadcast %c16_i32_138 : i32 to vector<1x1x32xi32>
    %291 = arith.cmpi sge, %5, %290 : vector<1x1x32xi32>
    %c24_i32_139 = arith.constant 24 : i32
    %292 = vector.broadcast %c24_i32_139 : i32 to vector<1x1x32xi32>
    %293 = arith.cmpi slt, %5, %292 : vector<1x1x32xi32>
    %294 = arith.andi %291, %293 : vector<1x1x32xi1>
    %295 = arith.extui %294 : vector<1x1x32xi1> to vector<1x1x32xi32>
    %296 = arith.sitofp %295 : vector<1x1x32xi32> to vector<1x1x32xf32>
    %297 = vector.broadcast %296 : vector<1x1x32xf32> to vector<2x8x32xf32>
    %298 = arith.mulf %234, %297 : vector<2x8x32xf32>
    "tpu.trace_start"() <{level = 10 : i32, message = "bqd,bkd->bqk"}> : () -> ()
    %cst_140 = arith.constant dense<0.000000e+00> : vector<2x8x8xf32>
    %299 = tpu.matmul %298, %235, %cst_140 {dimension_numbers = #tpu.dot_dimension_numbers<[2], [2], [1], [1], [0, 0, 0, 1, 1, 1], [0], [0]>} : vector<2x8x32xf32>, vector<2x8x32xf32>, vector<2x8x8xf32> -> vector<2x8x8xf32>
    "tpu.trace_stop"() : () -> ()
    %cst_141 = arith.constant 0.353553385 : f32
    %300 = vector.broadcast %cst_141 : f32 to vector<2x8x8xf32>
    %301 = arith.mulf %299, %300 : vector<2x8x8xf32>
    %cst_142 = arith.constant dense<0xFF800000> : vector<2x8xf32>
    %302 = vector.multi_reduction <maximumf>, %301, %cst_142 [2] : vector<2x8x8xf32> to vector<2x8xf32>
    %303 = vector.shape_cast %302 : vector<2x8xf32> to vector<2x8x1xf32>
    %304 = vector.broadcast %303 : vector<2x8x1xf32> to vector<2x8x8xf32>
    %305 = arith.subf %301, %304 : vector<2x8x8xf32>
    %306 = math.exp %305 : vector<2x8x8xf32>
    %cst_143 = arith.constant dense<0.000000e+00> : vector<2x8xf32>
    %307 = vector.multi_reduction <add>, %306, %cst_143 [2] : vector<2x8x8xf32> to vector<2x8xf32>
    %308 = vector.shape_cast %307 : vector<2x8xf32> to vector<2x8x1xf32>
    %309 = tpu.reciprocal %308 {approx = true} : vector<2x8x1xf32> -> vector<2x8x1xf32>
    %310 = vector.broadcast %309 : vector<2x8x1xf32> to vector<2x8x8xf32>
    %311 = arith.mulf %306, %310 : vector<2x8x8xf32>
    %312 = vector.broadcast %296 : vector<1x1x32xf32> to vector<2x8x32xf32>
    %313 = arith.mulf %236, %312 : vector<2x8x32xf32>
    "tpu.trace_start"() <{level = 10 : i32, message = "bqk,bkd->bqd"}> : () -> ()
    %cst_144 = arith.constant dense<0.000000e+00> : vector<2x8x32xf32>
    %314 = tpu.matmul %311, %313, %cst_144 {dimension_numbers = #tpu.dot_dimension_numbers<[2], [1], [1], [2], [0, 0, 0, 1, 1, 2], [0], [0]>} : vector<2x8x8xf32>, vector<2x8x32xf32>, vector<2x8x32xf32> -> vector<2x8x32xf32>
    "tpu.trace_stop"() : () -> ()
    %315 = arith.addf %289, %314 : vector<2x8x32xf32>
    %c24_i32_145 = arith.constant 24 : i32
    %316 = vector.broadcast %c24_i32_145 : i32 to vector<1x1x32xi32>
    %317 = arith.cmpi sge, %5, %316 : vector<1x1x32xi32>
    %c32_i32_146 = arith.constant 32 : i32
    %318 = vector.broadcast %c32_i32_146 : i32 to vector<1x1x32xi32>
    %319 = arith.cmpi slt, %5, %318 : vector<1x1x32xi32>
    %320 = arith.andi %317, %319 : vector<1x1x32xi1>
    %321 = arith.extui %320 : vector<1x1x32xi1> to vector<1x1x32xi32>
    %322 = arith.sitofp %321 : vector<1x1x32xi32> to vector<1x1x32xf32>
    %323 = vector.broadcast %322 : vector<1x1x32xf32> to vector<2x8x32xf32>
    %324 = arith.mulf %234, %323 : vector<2x8x32xf32>
    "tpu.trace_start"() <{level = 10 : i32, message = "bqd,bkd->bqk"}> : () -> ()
    %cst_147 = arith.constant dense<0.000000e+00> : vector<2x8x8xf32>
    %325 = tpu.matmul %324, %235, %cst_147 {dimension_numbers = #tpu.dot_dimension_numbers<[2], [2], [1], [1], [0, 0, 0, 1, 1, 1], [0], [0]>} : vector<2x8x32xf32>, vector<2x8x32xf32>, vector<2x8x8xf32> -> vector<2x8x8xf32>
    "tpu.trace_stop"() : () -> ()
    %cst_148 = arith.constant 0.353553385 : f32
    %326 = vector.broadcast %cst_148 : f32 to vector<2x8x8xf32>
    %327 = arith.mulf %325, %326 : vector<2x8x8xf32>
    %cst_149 = arith.constant dense<0xFF800000> : vector<2x8xf32>
    %328 = vector.multi_reduction <maximumf>, %327, %cst_149 [2] : vector<2x8x8xf32> to vector<2x8xf32>
    %329 = vector.shape_cast %328 : vector<2x8xf32> to vector<2x8x1xf32>
    %330 = vector.broadcast %329 : vector<2x8x1xf32> to vector<2x8x8xf32>
    %331 = arith.subf %327, %330 : vector<2x8x8xf32>
    %332 = math.exp %331 : vector<2x8x8xf32>
    %cst_150 = arith.constant dense<0.000000e+00> : vector<2x8xf32>
    %333 = vector.multi_reduction <add>, %332, %cst_150 [2] : vector<2x8x8xf32> to vector<2x8xf32>
    %334 = vector.shape_cast %333 : vector<2x8xf32> to vector<2x8x1xf32>
    %335 = tpu.reciprocal %334 {approx = true} : vector<2x8x1xf32> -> vector<2x8x1xf32>
    %336 = vector.broadcast %335 : vector<2x8x1xf32> to vector<2x8x8xf32>
    %337 = arith.mulf %332, %336 : vector<2x8x8xf32>
    %338 = vector.broadcast %322 : vector<1x1x32xf32> to vector<2x8x32xf32>
    %339 = arith.mulf %236, %338 : vector<2x8x32xf32>
    "tpu.trace_start"() <{level = 10 : i32, message = "bqk,bkd->bqd"}> : () -> ()
    %cst_151 = arith.constant dense<0.000000e+00> : vector<2x8x32xf32>
    %340 = tpu.matmul %337, %339, %cst_151 {dimension_numbers = #tpu.dot_dimension_numbers<[2], [1], [1], [2], [0, 0, 0, 1, 1, 2], [0], [0]>} : vector<2x8x8xf32>, vector<2x8x32xf32>, vector<2x8x32xf32> -> vector<2x8x32xf32>
    "tpu.trace_stop"() : () -> ()
    %341 = arith.addf %315, %340 : vector<2x8x32xf32>
    %342 = vector.shape_cast %341 : vector<2x8x32xf32> to vector<16x32xf32>
    %c1_152 = arith.constant 1 : index
    %c0_153 = arith.constant 0 : index
    %c0_154 = arith.constant 0 : index
    %343 = vector.load %arg4[%c1_152, %c0_153, %c0_154] : memref<2x32x32xf32, #tpu.memory_space<vmem>>, vector<1x32x32xf32>
    %344 = vector.shape_cast %343 : vector<1x32x32xf32> to vector<32x32xf32>
    %cst_155 = arith.constant dense<0.000000e+00> : vector<16x32xf32>
    %345 = tpu.matmul %342, %344, %cst_155 {dimension_numbers = #tpu.dot_dimension_numbers<[1], [0], [0], [1], [0, 0, 1, 1], [], []>} : vector<16x32xf32>, vector<32x32xf32>, vector<16x32xf32> -> vector<16x32xf32>
    %c1_156 = arith.constant 1 : index
    %c0_157 = arith.constant 0 : index
    %c0_158 = arith.constant 0 : index
    %346 = vector.load %arg5[%c1_156, %c0_157, %c0_158] : memref<2x1x32xf32, #tpu.memory_space<vmem>>, vector<1x1x32xf32>
    %347 = vector.shape_cast %346 : vector<1x1x32xf32> to vector<1x32xf32>
    %348 = vector.broadcast %347 : vector<1x32xf32> to vector<16x32xf32>
    %349 = arith.addf %345, %348 : vector<16x32xf32>
    %350 = arith.addf %212, %349 : vector<16x32xf32>
    %c1_159 = arith.constant 1 : index
    %c0_160 = arith.constant 0 : index
    %c0_161 = arith.constant 0 : index
    %351 = vector.load %arg6[%c1_159, %c0_160, %c0_161] : memref<2x1x32xf32, #tpu.memory_space<vmem>>, vector<1x1x32xf32>
    %352 = vector.shape_cast %351 : vector<1x1x32xf32> to vector<1x32xf32>
    %c1_162 = arith.constant 1 : index
    %c0_163 = arith.constant 0 : index
    %c0_164 = arith.constant 0 : index
    %353 = vector.load %arg7[%c1_162, %c0_163, %c0_164] : memref<2x1x32xf32, #tpu.memory_space<vmem>>, vector<1x1x32xf32>
    %354 = vector.shape_cast %353 : vector<1x1x32xf32> to vector<1x32xf32>
    %cst_165 = arith.constant dense<0.000000e+00> : vector<16xf32>
    %355 = vector.multi_reduction <add>, %350, %cst_165 [1] : vector<16x32xf32> to vector<16xf32>
    %356 = vector.shape_cast %355 : vector<16xf32> to vector<16x1xf32>
    %cst_166 = arith.constant 3.200000e+01 : f32
    %357 = vector.broadcast %cst_166 : f32 to vector<16x1xf32>
    %358 = arith.divf %356, %357 : vector<16x1xf32>
    %359 = vector.broadcast %358 : vector<16x1xf32> to vector<16x32xf32>
    %360 = arith.subf %350, %359 : vector<16x32xf32>
    %361 = arith.mulf %360, %360 : vector<16x32xf32>
    %cst_167 = arith.constant dense<0.000000e+00> : vector<16xf32>
    %362 = vector.multi_reduction <add>, %361, %cst_167 [1] : vector<16x32xf32> to vector<16xf32>
    %363 = vector.shape_cast %362 : vector<16xf32> to vector<16x1xf32>
    %cst_168 = arith.constant 3.200000e+01 : f32
    %364 = vector.broadcast %cst_168 : f32 to vector<16x1xf32>
    %365 = arith.divf %363, %364 : vector<16x1xf32>
    %366 = vector.broadcast %358 : vector<16x1xf32> to vector<16x32xf32>
    %367 = arith.subf %350, %366 : vector<16x32xf32>
    %cst_169 = arith.constant 9.99999974E-6 : f32
    %368 = vector.broadcast %cst_169 : f32 to vector<16x1xf32>
    %369 = arith.addf %365, %368 : vector<16x1xf32>
    %370 = math.rsqrt %369 : vector<16x1xf32>
    %371 = vector.broadcast %370 : vector<16x1xf32> to vector<16x32xf32>
    %372 = arith.mulf %367, %371 : vector<16x32xf32>
    %373 = vector.broadcast %352 : vector<1x32xf32> to vector<16x32xf32>
    %374 = arith.mulf %372, %373 : vector<16x32xf32>
    %375 = vector.broadcast %354 : vector<1x32xf32> to vector<16x32xf32>
    %376 = arith.addf %374, %375 : vector<16x32xf32>
    %c1_170 = arith.constant 1 : index
    %c0_171 = arith.constant 0 : index
    %c0_172 = arith.constant 0 : index
    %377 = vector.load %arg8[%c1_170, %c0_171, %c0_172] : memref<2x32x64xf32, #tpu.memory_space<vmem>>, vector<1x32x64xf32>
    %378 = vector.shape_cast %377 : vector<1x32x64xf32> to vector<32x64xf32>
    %cst_173 = arith.constant dense<0.000000e+00> : vector<16x64xf32>
    %379 = tpu.matmul %376, %378, %cst_173 {dimension_numbers = #tpu.dot_dimension_numbers<[1], [0], [0], [1], [0, 0, 1, 1], [], []>} : vector<16x32xf32>, vector<32x64xf32>, vector<16x64xf32> -> vector<16x64xf32>
    %c1_174 = arith.constant 1 : index
    %c0_175 = arith.constant 0 : index
    %c0_176 = arith.constant 0 : index
    %380 = vector.load %arg9[%c1_174, %c0_175, %c0_176] : memref<2x1x64xf32, #tpu.memory_space<vmem>>, vector<1x1x64xf32>
    %381 = vector.shape_cast %380 : vector<1x1x64xf32> to vector<1x64xf32>
    %382 = vector.broadcast %381 : vector<1x64xf32> to vector<16x64xf32>
    %383 = arith.addf %379, %382 : vector<16x64xf32>
    %cst_177 = arith.constant 0.000000e+00 : f32
    %384 = vector.broadcast %cst_177 : f32 to vector<16x64xf32>
    %385 = arith.maximumf %383, %384 : vector<16x64xf32>
    %c1_178 = arith.constant 1 : index
    %c0_179 = arith.constant 0 : index
    %c0_180 = arith.constant 0 : index
    %386 = vector.load %arg10[%c1_178, %c0_179, %c0_180] : memref<2x64x32xf32, #tpu.memory_space<vmem>>, vector<1x64x32xf32>
    %387 = vector.shape_cast %386 : vector<1x64x32xf32> to vector<64x32xf32>
    %cst_181 = arith.constant dense<0.000000e+00> : vector<16x32xf32>
    %388 = tpu.matmul %385, %387, %cst_181 {dimension_numbers = #tpu.dot_dimension_numbers<[1], [0], [0], [1], [0, 0, 1, 1], [], []>} : vector<16x64xf32>, vector<64x32xf32>, vector<16x32xf32> -> vector<16x32xf32>
    %c1_182 = arith.constant 1 : index
    %c0_183 = arith.constant 0 : index
    %c0_184 = arith.constant 0 : index
    %389 = vector.load %arg11[%c1_182, %c0_183, %c0_184] : memref<2x1x32xf32, #tpu.memory_space<vmem>>, vector<1x1x32xf32>
    %390 = vector.shape_cast %389 : vector<1x1x32xf32> to vector<1x32xf32>
    %391 = vector.broadcast %390 : vector<1x32xf32> to vector<16x32xf32>
    %392 = arith.addf %388, %391 : vector<16x32xf32>
    %393 = arith.addf %376, %392 : vector<16x32xf32>
    %c1_185 = arith.constant 1 : index
    %c0_186 = arith.constant 0 : index
    %c0_187 = arith.constant 0 : index
    %394 = vector.load %arg12[%c1_185, %c0_186, %c0_187] : memref<2x1x32xf32, #tpu.memory_space<vmem>>, vector<1x1x32xf32>
    %395 = vector.shape_cast %394 : vector<1x1x32xf32> to vector<1x32xf32>
    %c1_188 = arith.constant 1 : index
    %c0_189 = arith.constant 0 : index
    %c0_190 = arith.constant 0 : index
    %396 = vector.load %arg13[%c1_188, %c0_189, %c0_190] : memref<2x1x32xf32, #tpu.memory_space<vmem>>, vector<1x1x32xf32>
    %397 = vector.shape_cast %396 : vector<1x1x32xf32> to vector<1x32xf32>
    %cst_191 = arith.constant dense<0.000000e+00> : vector<16xf32>
    %398 = vector.multi_reduction <add>, %393, %cst_191 [1] : vector<16x32xf32> to vector<16xf32>
    %399 = vector.shape_cast %398 : vector<16xf32> to vector<16x1xf32>
    %cst_192 = arith.constant 3.200000e+01 : f32
    %400 = vector.broadcast %cst_192 : f32 to vector<16x1xf32>
    %401 = arith.divf %399, %400 : vector<16x1xf32>
    %402 = vector.broadcast %401 : vector<16x1xf32> to vector<16x32xf32>
    %403 = arith.subf %393, %402 : vector<16x32xf32>
    %404 = arith.mulf %403, %403 : vector<16x32xf32>
    %cst_193 = arith.constant dense<0.000000e+00> : vector<16xf32>
    %405 = vector.multi_reduction <add>, %404, %cst_193 [1] : vector<16x32xf32> to vector<16xf32>
    %406 = vector.shape_cast %405 : vector<16xf32> to vector<16x1xf32>
    %cst_194 = arith.constant 3.200000e+01 : f32
    %407 = vector.broadcast %cst_194 : f32 to vector<16x1xf32>
    %408 = arith.divf %406, %407 : vector<16x1xf32>
    %409 = vector.broadcast %401 : vector<16x1xf32> to vector<16x32xf32>
    %410 = arith.subf %393, %409 : vector<16x32xf32>
    %cst_195 = arith.constant 9.99999974E-6 : f32
    %411 = vector.broadcast %cst_195 : f32 to vector<16x1xf32>
    %412 = arith.addf %408, %411 : vector<16x1xf32>
    %413 = math.rsqrt %412 : vector<16x1xf32>
    %414 = vector.broadcast %413 : vector<16x1xf32> to vector<16x32xf32>
    %415 = arith.mulf %410, %414 : vector<16x32xf32>
    %416 = vector.broadcast %395 : vector<1x32xf32> to vector<16x32xf32>
    %417 = arith.mulf %415, %416 : vector<16x32xf32>
    %418 = vector.broadcast %397 : vector<1x32xf32> to vector<16x32xf32>
    %419 = arith.addf %417, %418 : vector<16x32xf32>
    %c0_196 = arith.constant 0 : index
    %c0_197 = arith.constant 0 : index
    %420 = vector.load %arg14[%c0_196, %c0_197] : memref<32x1xf32, #tpu.memory_space<vmem>>, vector<32x1xf32>
    %cst_198 = arith.constant dense<0.000000e+00> : vector<16x1xf32>
    %421 = tpu.matmul %419, %420, %cst_198 {dimension_numbers = #tpu.dot_dimension_numbers<[1], [0], [0], [1], [0, 0, 1, 1], [], []>} : vector<16x32xf32>, vector<32x1xf32>, vector<16x1xf32> -> vector<16x1xf32>
    %c0_199 = arith.constant 0 : index
    %c0_200 = arith.constant 0 : index
    %422 = vector.load %arg15[%c0_199, %c0_200] : memref<1x1xf32, #tpu.memory_space<vmem>>, vector<1x1xf32>
    %423 = vector.broadcast %422 : vector<1x1xf32> to vector<16x1xf32>
    %424 = arith.addf %421, %423 : vector<16x1xf32>
    %c0_201 = arith.constant 0 : index
    %c0_202 = arith.constant 0 : index
    %425 = vector.load %arg16[%c0_201, %c0_202] : memref<16x1xf32, #tpu.memory_space<vmem>>, vector<16x1xf32>
    tpu.vector_store %arg16[%c0_201, %c0_202], %424 {strides = array<i32>} : memref<16x1xf32, #tpu.memory_space<vmem>>, vector<16x1xf32>,
    return
  }
}

</mosaic_0001>

<bundles_post_ra>
// kernel: tpu_custom_call.1
= control target key start
LH: loop header
LB: loop body
LE: loop exit
PB: predicated region body
PF: predicated region fallthrough
CT: control target
= control target key end

     0   :  { %s5509_s0 = inlined_call_operand.vmem [shape: f32[16,32], index: 0, kind: input, shape index: {}]   ;;  %s5510_s1 = inlined_call_operand.vmem [shape: f32[16,32], index: 1, kind: input, shape index: {}]   ;;  %s5511_s2 = inlined_call_operand.vmem [shape: f32[2,3,32,32], index: 2, kind: input, shape index: {}]   ;;  %s5512_s3 = inlined_call_operand.vmem [shape: f32[2,3,1,32], index: 3, kind: input, shape index: {}]   ;;  %s5513_s4 = inlined_call_operand.hbm [shape: f32[2,32,32], index: 4, kind: input, shape index: {}]   ;;  %s5514_s5 = inlined_call_operand.vmem [shape: f32[2,1,32], index: 5, kind: input, shape index: {}]   ;;  %s5515_s6 = inlined_call_operand.vmem [shape: f32[2,1,32], index: 6, kind: input, shape index: {}]   ;;  %s5516_s7 = inlined_call_operand.vmem [shape: f32[2,1,32], index: 7, kind: input, shape index: {}]   ;;  %s5517_s8 = inlined_call_operand.hbm [shape: f32[2,32,64], index: 8, kind: input, shape index: {}]   ;;  %s5518_s9 = inlined_call_operand.vmem [shape: f32[2,1,64], index: 9, kind: input, shape index: {}]   ;;  %s5519_s10 = inlined_call_operand.vmem [shape: f32[2,64,32], index: 10, kind: input, shape index: {}]   ;;  %s5520_s11 = inlined_call_operand.vmem [shape: f32[2,1,32], index: 11, kind: input, shape index: {}]   ;;  %s5521_s12 = inlined_call_operand.vmem [shape: f32[2,1,32], index: 12, kind: input, shape index: {}]   ;;  %s5522_s13 = inlined_call_operand.vmem [shape: f32[2,1,32], index: 13, kind: input, shape index: {}]   ;;  %s5523_s14 = inlined_call_operand.vmem [shape: f32[32,1], index: 14, kind: input, shape index: {}]   ;;  %s5524_s15 = inlined_call_operand.<no memory space> [shape: f32[1,1], index: 15, kind: input, shape index: {}]   ;;  %s5525_s16 = inlined_call_operand.vmem [shape: f32[16,1], index: 16, kind: output, shape index: {}]  }
   0x1   :  { %5527 = sst [smem:[#allocation9_spill]] %s5509_s0  ;;  %v21_v0 = vstv %s5524_s15 }
   0x2   :  { %22 = vst [vmem:[#allocation2] sm:$0x1] %v21_v0 }
   0x3   :  { %23 = vsyncpa [#allocation4], 0 }
   0x4   :  { %24 = vsyncpa [#allocation6], 0  ;;  %s4832_s23 = smov [#allocation3]  }
   0x5   :  { %s38_s24 = sshll.u32 %s4832_s23, 4  ;;  %s39_s24 = int_to_ptr.vmem [resolvable:$true] %s38_s24 }
   0x6   :  { %s4796_s25 = scalar_lea.vmem %s39_s24, 1024  ;;  %p4801_p1 = scmp.lt.s32.totalorder %s39_s24, %s39_s24 }
   0x7   :  { %p4797_p0 = scmp.ne.s32.totalorder %s39_s24, %s4796_s25  ;;  %p4802_p2 = scmp.lt.s32.totalorder %s4796_s25, %s4796_s25 }
   0x9   :  { %p4803_p3 = por %p4802_p2, %p4801_p1 }
   0xb   :  { %p4804_p4 = pnand %p4803_p3, %p4797_p0 }
   0xd   :  { %4807 = shalt.err (!%p4804_p4)
}
   0xe   :  { %s4833_s26 = smov 128   ;;  %s4834_s27 = smov 8  }
   0xf   :  { %44 = dma.hbm_to_vmem [thread:$0]  %s5513_s4, 1024, %s39_s24, [#allocation4], %s4833_s26, %s4833_s26, %s4834_s27  }
  0x10   :  { %s4835_s15 = smov [#allocation5]  }
  0x11   :  { %s56_s30 = sshll.u32 %s4835_s15, 4  ;;  %s57_s30 = int_to_ptr.vmem [resolvable:$true] %s56_s30 }
  0x12   :  { %s4816_s0 = scalar_lea.vmem %s57_s30, 1024  ;;  %p4821_p6 = scmp.lt.s32.totalorder %s57_s30, %s57_s30 }
  0x13   :  { %p4817_p5 = scmp.ne.s32.totalorder %s57_s30, %s4816_s0  ;;  %p4822_p7 = scmp.lt.s32.totalorder %s4816_s0, %s4816_s0 }
  0x15   :  { %p4823_p8 = por %p4822_p7, %p4821_p6 }
  0x17   :  { %p4824_p9 = pnand %p4823_p8, %p4817_p5 }
  0x19   :  { %4827 = shalt.err (!%p4824_p9)
}
  0x1a   :  { %62 = dma.hbm_to_vmem [thread:$0]  %s5517_s8, 1024, %s57_s30, [#allocation6], %s4833_s26, %s4833_s26, %s4834_s27  }
  0x1b   :  { %4828 = dma.done.wait [#allocation4], 1024  }
  0x1c   :  { %4829 = vsyncadd [#allocation4], 4294966272 }
  0x1d   :  { %4830 = dma.done.wait [#allocation6], 1024  }
  0x1e   :  { %4831 = vsyncadd [#allocation6], 4294966272  ;;  %v96_v1 = vld [vmem:[%s5511_s2 + $0x18] sm:$0xff]  ;;  %v95_v3 = vld [vmem:[%s5511_s2 + $0x10] sm:$0xff]  ;;  %s5528_s30 = sld [smem:[#allocation9_spill]]  ;;  %vm104_vm0 = vcmask 261120   ;;  %v91_v18 = vlaneseq }
  0x1f   :  { %v4100_v2 = vld [vmem:[%s5511_s2 + $0x38] sm:$0xff]  ;;  %4383 = vmatprep.subr.mxu0 %v96_v1  ;;  %v4099_v4 = vld [vmem:[%s5511_s2 + $0x30] sm:$0xff]  ;;  %v94_v5 = vld [vmem:[%s5511_s2 + $0x8] sm:$0xff]  ;;  %v4836_v17 = vmov 0.0   ;;  %vm4837_vm1 = vmmov 0   ;;  %vm523_vm6 = vcmask 64512  }
  0x20   :  { %4394 = vmatprep.subr.mxu1 %v4100_v2  ;;  %4384 = vmatpush3.msra.mxu0 %v96_v1  ;;  %v4098_v6 = vld [vmem:[%s5511_s2 + $0x28] sm:$0xff]  ;;  %v87_v9 = vld [vmem:[%s5510_s1] sm:$0xff]  ;;  %v4985_v19 = vand.u32 127, %v91_v18  ;;  %v4108_v36 = vld [vmem:[%s5511_s2 + $0x58] sm:$0xff]  ;;  %vm1921_vm13 = vcmask 523264   ;;  %vm4085_vm14 = vcmask 7168  }
  0x21   :  { %4395 = vmatpush3.msra.mxu1 %v4100_v2  ;;  %4385 = vmatprep.subr.mxu0 %v95_v3  ;;  %v88_v11 = vld [vmem:[%s5510_s1 + $0x8] sm:$0xff]  ;;  %v93_v12 = vld [vmem:[%s5511_s2] sm:$0xff]  ;;  %v4107_v37 = vld [vmem:[%s5511_s2 + $0x50] sm:$0xff] }
  0x22   :  { %4396 = vmatprep.subr.mxu1 %v4099_v4  ;;  %4386 = vmatpush3.msra.mxu0 %v95_v3  ;;  %v4097_v13 = vld [vmem:[%s5511_s2 + $0x20] sm:$0xff]  ;;  %vm363_vm2 = vcmp.lt.s32.totalorder %v4985_v19, 8  ;;  %vm548_vm3 = vcmp.ge.s32.totalorder %v4985_v19, 8  ;;  %vm549_vm4 = vcmp.lt.s32.totalorder %v4985_v19, 16  ;;  %v4106_v38 = vld [vmem:[%s5511_s2 + $0x48] sm:$0xff]  ;;  %vm1019_vm7 = vcmp.ge.s32.totalorder %v4985_v19, 16 }
  0x23   :  { %4397 = vmatpush3.msra.mxu1 %v4099_v4  ;;  %4387 = vmatprep.subr.mxu0 %v94_v5  ;;  %v4094_v22 = vld [vmem:[%s5512_s3] ss:$0 sm:$0xff]  ;;  %v4992_v25 = vsel %vm363_vm2, 1.0, %v4836_v17  ;;  %v4102_v26 = vld [vmem:[%s5512_s3 + $0x1] ss:$0 sm:$0xff]  ;;  %vm550_vm5 = vmand %vm548_vm3, %vm549_vm4  ;;  %vm1020_vm8 = vcmp.lt.s32.totalorder %v4985_v19, 24 }
  0x24   :  { %v83_v7 = vld [vmem:[%s5528_s30] sm:$0xff]  ;;  %v84_v10 = vld [vmem:[%s5528_s30 + $0x8] sm:$0xff]  ;;  %4398 = vmatprep.subr.mxu1 %v4098_v6  ;;  %4388 = vmatpush3.msra.mxu0 %v94_v5  ;;  %v5021_v33 = vsel %vm550_vm5, 1.0, %v4836_v17  ;;  %vm1021_vm9 = vmand %vm1019_vm7, %vm1020_vm8  ;;  %vm1346_vm10 = vcmp.ge.s32.totalorder %v4985_v19, 24  ;;  %vm1347_vm11 = vcmp.lt.s32.totalorder %v4985_v19, 32 }
  0x25   :  { %v85_v8 = vmul.f32 5.656854, %v83_v7  ;;  %v86_v14 = vmul.f32 5.656854, %v84_v10  ;;  %4399 = vmatpush3.msra.mxu1 %v4098_v6  ;;  %4389 = vmatprep.subr.mxu0 %v93_v12  ;;  %v4105_v39 = vld [vmem:[%s5511_s2 + $0x40] sm:$0xff]  ;;  %vm1348_vm12 = vmand %vm1346_vm10, %vm1347_vm11 }
  0x26   :  { %4400 = vmatprep.subr.mxu1 %v4097_v13  ;;  %4390 = vmatpush3.msra.mxu0 %v93_v12 }
  0x27   :  { %v4968_v15 = vadd.f32 %v87_v9, %v85_v8  ;;  %v4970_v16 = vadd.f32 %v88_v11, %v86_v14  ;;  %4401 = vmatpush3.msra.mxu1 %v4097_v13  ;;  %4405 = vmatprep.subr.mxu0 %v4108_v36  ;;  %v4110_v13 = vld [vmem:[%s5512_s3 + $0x2] ss:$0 sm:$0xff] }
  0x28   :  { %4416 = vmatprep.subr.mxu1 %v4836_v17 }
  0x29   :  { %4391 = vmatprep.mubr.msk.f32.mxu0 %vm104_vm0, %v4968_v15  ;;  %4402 = vmatprep.mubr.msk.f32.mxu1 %vm104_vm0, %v4968_v15 }
  0x2a   :  { %4392 = vmatmul.mubr.msk.f32.vlgmr.msra.gmra.mxu0 %vm104_vm0, %v4970_v16  ;;  %4403 = vmatmul.mubr.msk.f32.vlgmr.msra.gmra.mxu1 %vm104_vm0, %v4970_v16 }
  0x2b   :  { %4413 = vmatprep.mubr.msk.f32.mxu0 %vm104_vm0, %v4968_v15  ;;  %4418 = vmatprep.mubr.msk.f32.mxu1 %vm4837_vm1, %v4836_v17 }
  0x2c   :  { %4406 = vmatpush3.msra.mxu0 %v4108_v36 }
  0x2d   :  { %4407 = vmatprep.subr.mxu0 %v4107_v37 }
  0x2e   :  { %4408 = vmatpush3.msra.mxu0 %v4107_v37 }
  0x2f   :  { %4409 = vmatprep.subr.mxu0 %v4106_v38 }
  0x30   :  { %4410 = vmatpush3.msra.mxu0 %v4106_v38 }
  0x31   :  { %4411 = vmatprep.subr.mxu0 %v4105_v39 }
  0x32   :  { %4412 = vmatpush3.msra.mxu0 %v4105_v39 }
  0x33   :  { %4414 = vmatmul.mubr.msk.f32.vlgmr.msra.gmra.mxu0 %vm104_vm0, %v4970_v16  ;;  %4436 = vmatprep.subr.mxu0 %v4836_v17 }
  0x34   :  { %4438 = vmatprep.mubr.msk.f32.mxu0 %vm4837_vm1, %v4836_v17 }
  0xea   :  { %v4393_v20 = vpop.f32.mrf.mxu0  ;;  %v4404_v21 = vpop.f32.mrf.mxu1 }
  0xeb   :  { %v5007_v30 = vadd.f32 %v4393_v20, %v4094_v22  ;;  %v5010_v31 = vadd.f32 %v4404_v21, %v4102_v26 }
  0xec   :  { %v177_v23 = vpop.f32.mrf.mxu0  ;;  %v265_v24 = vpop.f32.mrf.mxu1 }
  0xed   :  { %v4997_v27 = vadd.f32 %v4094_v22, %v177_v23  ;;  %v4999_v28 = vadd.f32 %v4102_v26, %v265_v24  ;;  %v368_v32 = vmul.f32 %v4992_v25, %v5007_v30  ;;  %v554_v35 = vmul.f32 %v5021_v33, %v5007_v30 }
  0xef   :  { %v367_v29 = vmul.f32 %v4992_v25, %v4997_v27  ;;  %4417 = vmatpush3.xpose.msk.msra.mxu1 %vm104_vm0, %v4999_v28  ;;  %v553_v34 = vmul.f32 %v5021_v33, %v4997_v27 }
  0xf0   :  { %4421 = vmatprep.subr.mxu1 %v4836_v17 }
  0xf2   :  { %4419 = vmatmul.mubr.msk.f32.vlgmr.msra.gmra.mxu1 %vm104_vm0, %v367_v29 }
  0xf3   :  { %4422 = vmatpush3.xpose.msk.msra.mxu1 %vm104_vm0, %v5010_v31  ;;  %4423 = vmatprep.mubr.msk.f32.mxu1 %vm4837_vm1, %v4836_v17  ;;  %v4415_v12 = vpop.f32.mrf.mxu0 }
  0xf4   :  { %4426 = vmatprep.subr.mxu1 %v4836_v17  ;;  %v5070_v14 = vadd.f32 %v4415_v12, %v4110_v13 }
  0xf5   :  { %v353_v18 = vpop.f32.mrf.mxu0 }
  0xf6   :  { %4424 = vmatmul.mubr.msk.f32.vlgmr.msra.gmra.mxu1 %vm104_vm0, %v368_v32  ;;  %v726_v20 = vmul.f32 %v5021_v33, %v5070_v14  ;;  %v5074_v21 = vadd.f32 %v4110_v13, %v353_v18 }
  0xf7   :  { %4427 = vmatpush3.xpose.msk.msra.mxu1 %vm104_vm0, %v4999_v28  ;;  %4428 = vmatprep.mubr.msk.f32.mxu1 %vm4837_vm1, %v4836_v17 }
  0xf8   :  { %4431 = vmatprep.subr.mxu1 %v4836_v17  ;;  %v725_v22 = vmul.f32 %v5021_v33, %v5074_v21 }
  0xfa   :  { %4429 = vmatmul.mubr.msk.f32.vlgmr.msra.gmra.mxu1 %vm104_vm0, %v553_v34  ;;  %4437 = vmatpush3.msra.mxu0 %v725_v22  ;;  %v546_v34 = vmul.f32 %v4992_v25, %v5074_v21  ;;  %v5132_v22 = vsel %vm1348_vm12, 1.0, %v4836_v17 }
  0xfb   :  { %4432 = vmatpush3.xpose.msk.msra.mxu1 %vm104_vm0, %v5010_v31  ;;  %4433 = vmatprep.mubr.msk.f32.mxu1 %vm4837_vm1, %v4836_v17  ;;  %v1523_v19 = vmul.f32 %v5132_v22, %v5074_v21 }
  0xfc   :  { %4441 = vmatprep.subr.mxu1 %v4836_v17  ;;  %4446 = vmatprep.subr.mxu0 %v4836_v17 }
  0xfe   :  { %4434 = vmatmul.mubr.msk.f32.vlgmr.msra.gmra.mxu1 %vm104_vm0, %v554_v35 }
  0xff   :  { %4443 = vmatprep.mubr.msk.f32.mxu1 %vm4837_vm1, %v4836_v17  ;;  %4442 = vmatpush3.msra.mxu1 %v726_v20 }
 0x100   :  { %4451 = vmatprep.subr.mxu1 %v4836_v17 }
 0x1b2   :  { %v441_v40 = vpop.f32.mrf.mxu1 }
 0x1b3   :  { %v521_v41 = vmul.f32 0.35355338, %v441_v40  ;;  %v547_v40 = vmul.f32 %v4992_v25, %v5070_v14 }
 0x1b4   :  { %v4420_v42 = vpop.f32.mrf.mxu1 }
 0x1b5   :  { %v524_v43 = vsel %vm523_vm6, %v521_v41, -inf }
 0x1b6   :  { %525 = vmax.xlane.f32.xlu1 %v524_v43  ;;  %v517_v44 = vpop.f32.mrf.mxu1 }
 0x1b7   :  { %v522_v45 = vmul.f32 0.35355338, %v517_v44 }
 0x1b8   :  { %v4425_v46 = vpop.f32.mrf.mxu1 }
 0x1b9   :  { %v527_v47 = vsel %vm523_vm6, %v522_v45, -inf }
 0x1ba   :  { %528 = vmax.xlane.f32.xlu1 %v527_v47  ;;  %v624_v48 = vpop.f32.mrf.mxu1 }
 0x1bb   :  { %v701_v49 = vmul.f32 0.35355338, %v624_v48 }
 0x1bc   :  { %v4430_v50 = vpop.f32.mrf.mxu1 }
 0x1bd   :  { %v703_v51 = vsel %vm523_vm6, %v701_v49, -inf }
 0x1be   :  { %704 = vmax.xlane.f32.xlu0 %v703_v51  ;;  %v697_v52 = vpop.f32.mrf.mxu1 }
 0x1bf   :  { %v702_v53 = vmul.f32 0.35355338, %v697_v52 }
 0x1c0   :  { %v4435_v54 = vpop.f32.mrf.mxu1 }
 0x1c1   :  { %v706_v55 = vsel %vm523_vm6, %v702_v53, -inf }
 0x1c2   :  { %707 = vmax.xlane.f32.xlu0 %v706_v55 }
 0x23f   :  { %v526_v56 = vpop.xlane.xlu1 %525 }
 0x240   :  { %v530_v57 = vsub.f32 %v521_v41, %v526_v56  ;;  %v5091_v41 = vsel %vm1021_vm9, 1.0, %v4836_v17 }
 0x241   :  { %v1024_v44 = vmul.f32 %v5091_v41, %v4997_v27  ;;  %v1025_v46 = vmul.f32 %v5091_v41, %v5007_v30  ;;  %v1197_v47 = vmul.f32 %v5091_v41, %v5070_v14 }
 0x242   :  { %v532_v61 = vmul.f32 1.442695, %v530_v57 }
 0x243   :  { %v529_v58 = vpop.xlane.xlu1 %528 }
 0x244   :  { %v531_v62 = vsub.f32 %v522_v45, %v529_v58  ;;  %v1196_v45 = vmul.f32 %v5091_v41, %v5074_v21 }
 0x246   :  { %v534_v2 = vmul.f32 1.442695, %v531_v62 }
 0x247   :  { %v705_v59 = vpop.xlane.xlu0 %704 }
 0x248   :  { %v709_v60 = vsub.f32 %v701_v49, %v705_v59 }
 0x24a   :  { %v711_v63 = vmul.f32 1.442695, %v709_v60 }
 0x24b   :  { %v708_v0 = vpop.xlane.xlu0 %707 }
 0x24c   :  { %4708 = vpow2.f32 %v711_v63  ;;  %v710_v1 = vsub.f32 %v702_v53, %v708_v0 }
 0x24d   :  { %4710 = vpow2.f32 %v532_v61 }
 0x24e   :  { %v713_v3 = vmul.f32 1.442695, %v710_v1 }
 0x250   :  { %4712 = vpow2.f32 %v713_v3 }
 0x251   :  { %4714 = vpow2.f32 %v534_v2 }
 0x259   :  { %v4709_v4 = vpop.eup %4708 }
 0x25a   :  { %v715_v5 = vsel %vm523_vm6, %v4709_v4, 0.0  ;;  %v4711_v6 = vpop.eup %4710 }
 0x25b   :  { %716 = vadd.xlane.f32.xlu0 %v715_v5  ;;  %v536_v8 = vsel %vm523_vm6, %v4711_v6, 0.0 }
 0x25d   :  { %v4713_v7 = vpop.eup %4712 }
 0x25e   :  { %v718_v9 = vsel %vm523_vm6, %v4713_v7, 0.0  ;;  %v4715_v10 = vpop.eup %4714 }
 0x25f   :  { %537 = vadd.xlane.f32.xlu0 %v536_v8  ;;  %719 = vadd.xlane.f32.xlu1 %v718_v9  ;;  %v539_v11 = vsel %vm523_vm6, %v4715_v10, 0.0 }
 0x263   :  { %540 = vadd.xlane.f32.xlu1 %v539_v11 }
 0x2e4   :  { %v717_v23 = vpop.xlane.xlu0 %716 }
 0x2e5   :  { %4716 = vrcp.f32 %v717_v23 }
 0x2e8   :  { %v720_v24 = vpop.xlane.xlu1 %719  ;;  %v538_v26 = vpop.xlane.xlu0 %537 }
 0x2e9   :  { %4718 = vrcp.f32 %v720_v24 }
 0x2ea   :  { %4720 = vrcp.f32 %v538_v26  ;;  %v1351_v26 = vmul.f32 %v5132_v22, %v4997_v27  ;;  %v1524_v27 = vmul.f32 %v5132_v22, %v5070_v14 }
 0x2ec   :  { %v541_v29 = vpop.xlane.xlu1 %540 }
 0x2ed   :  { %4722 = vrcp.f32 %v541_v29 }
 0x2f2   :  { %v4717_v32 = vpop.eup %4716 }
 0x2f3   :  { %v723_v35 = vmul.f32 %v4717_v32, %v4709_v4 }
 0x2f5   :  { %4439 = vmatmul.mubr.msk.f32.vlgmr.msra.gmra.mxu0 %vm523_vm6, %v723_v35 }
 0x2f6   :  { %v4719_v36 = vpop.eup %4718  ;;  %4447 = vmatpush3.msra.mxu0 %v546_v34  ;;  %4448 = vmatprep.mubr.msk.f32.mxu0 %vm4837_vm1, %v4836_v17 }
 0x2f7   :  { %v4721_v37 = vpop.eup %4720  ;;  %4456 = vmatprep.subr.mxu0 %v4836_v17  ;;  %v724_v38 = vmul.f32 %v4719_v36, %v4713_v7 }
 0x2f8   :  { %v544_v39 = vmul.f32 %v4721_v37, %v4711_v6 }
 0x2f9   :  { %4444 = vmatmul.mubr.msk.f32.vlgmr.msra.gmra.mxu1 %vm523_vm6, %v724_v38 }
 0x2fa   :  { %v4723_v42 = vpop.eup %4722  ;;  %4449 = vmatmul.mubr.msk.f32.vlgmr.msra.gmra.mxu0 %vm523_vm6, %v544_v39  ;;  %4452 = vmatpush3.msra.mxu1 %v547_v40 }
 0x2fb   :  { %4457 = vmatpush3.xpose.msk.msra.mxu0 %vm104_vm0, %v4999_v28  ;;  %4453 = vmatprep.mubr.msk.f32.mxu1 %vm4837_vm1, %v4836_v17  ;;  %v545_v43 = vmul.f32 %v4723_v42, %v4715_v10 }
 0x2fc   :  { %4458 = vmatprep.mubr.msk.f32.mxu0 %vm4837_vm1, %v4836_v17  ;;  %4461 = vmatprep.subr.mxu1 %v4836_v17 }
 0x2fd   :  { %4466 = vmatprep.subr.mxu0 %v4836_v17  ;;  %4454 = vmatmul.mubr.msk.f32.vlgmr.msra.gmra.mxu1 %vm523_vm6, %v545_v43 }
 0x2fe   :  { %4459 = vmatmul.mubr.msk.f32.vlgmr.msra.gmra.mxu0 %vm104_vm0, %v1024_v44  ;;  %4462 = vmatpush3.xpose.msk.msra.mxu1 %vm104_vm0, %v5010_v31 }
 0x2ff   :  { %4467 = vmatpush3.msra.mxu0 %v1196_v45  ;;  %4463 = vmatprep.mubr.msk.f32.mxu1 %vm4837_vm1, %v4836_v17 }
 0x300   :  { %4471 = vmatprep.subr.mxu1 %v4836_v17  ;;  %4468 = vmatprep.mubr.msk.f32.mxu0 %vm4837_vm1, %v4836_v17 }
 0x301   :  { %4464 = vmatmul.mubr.msk.f32.vlgmr.msra.gmra.mxu1 %vm104_vm0, %v1025_v46  ;;  %4476 = vmatprep.subr.mxu0 %v4836_v17 }
 0x302   :  { %4472 = vmatpush3.msra.mxu1 %v1197_v47  ;;  %4473 = vmatprep.mubr.msk.f32.mxu1 %vm4837_vm1, %v4836_v17 }
 0x303   :  { %4481 = vmatprep.subr.mxu1 %v4836_v17 }
 0x3b5   :  { %v796_v48 = vpop.f32.mrf.mxu0 }
 0x3b7   :  { %v4440_v49 = vpop.f32.mrf.mxu0 }
 0x3b9   :  { %v869_v50 = vpop.f32.mrf.mxu1 }
 0x3ba   :  { %v942_v51 = vpop.f32.mrf.mxu0 }
 0x3bb   :  { %v943_v52 = vadd.f32 %v942_v51, %v796_v48  ;;  %v4445_v53 = vpop.f32.mrf.mxu1 }
 0x3bc   :  { %v4450_v54 = vpop.f32.mrf.mxu0  ;;  %v1676_v53 = vld [vmem:[#allocation3 + $0x18] sm:$0xff] }
 0x3bd   :  { %v1015_v55 = vpop.f32.mrf.mxu1 }
 0x3be   :  { %v1016_v56 = vadd.f32 %v1015_v55, %v869_v50  ;;  %v1095_v57 = vpop.f32.mrf.mxu0 }
 0x3bf   :  { %v1172_v58 = vmul.f32 0.35355338, %v1095_v57  ;;  %v4455_v59 = vpop.f32.mrf.mxu1 }
 0x3c0   :  { %v4460_v60 = vpop.f32.mrf.mxu0 }
 0x3c1   :  { %v1174_v61 = vsel %vm523_vm6, %v1172_v58, -inf  ;;  %v1168_v62 = vpop.f32.mrf.mxu1  ;;  %v1675_v60 = vld [vmem:[#allocation3 + $0x10] sm:$0xff] }
 0x3c2   :  { %1175 = vmax.xlane.f32.xlu0 %v1174_v61  ;;  %v1173_v63 = vmul.f32 0.35355338, %v1168_v62  ;;  %v1674_v61 = vld [vmem:[#allocation3 + $0x8] sm:$0xff]  ;;  %v1673_v62 = vld [vmem:[#allocation3] sm:$0xff] }
 0x3c3   :  { %v4465_v0 = vpop.f32.mrf.mxu1 }
 0x3c4   :  { %v1177_v1 = vsel %vm523_vm6, %v1173_v63, -inf }
 0x3c5   :  { %1178 = vmax.xlane.f32.xlu1 %v1177_v1 }
 0x44b   :  { %v1176_v2 = vpop.xlane.xlu0 %1175 }
 0x44c   :  { %v1180_v3 = vsub.f32 %v1172_v58, %v1176_v2 }
 0x44e   :  { %v1182_v4 = vmul.f32 1.442695, %v1180_v3  ;;  %v1179_v5 = vpop.xlane.xlu1 %1178 }
 0x44f   :  { %v1181_v6 = vsub.f32 %v1173_v63, %v1179_v5  ;;  %v4141_v5 = vld [vmem:[%s5514_s5] ss:$0 sm:$0xff] }
 0x450   :  { %4724 = vpow2.f32 %v1182_v4 }
 0x451   :  { %v1184_v7 = vmul.f32 1.442695, %v1181_v6 }
 0x453   :  { %4726 = vpow2.f32 %v1184_v7 }
 0x45d   :  { %v4725_v8 = vpop.eup %4724 }
 0x45e   :  { %v1186_v9 = vsel %vm523_vm6, %v4725_v8, 0.0 }
 0x45f   :  { %1187 = vadd.xlane.f32.xlu0 %v1186_v9 }
 0x460   :  { %v4727_v10 = vpop.eup %4726 }
 0x461   :  { %v1189_v11 = vsel %vm523_vm6, %v4727_v10, 0.0 }
 0x462   :  { %1190 = vadd.xlane.f32.xlu1 %v1189_v11 }
 0x4e8   :  { %v1188_v12 = vpop.xlane.xlu0 %1187 }
 0x4e9   :  { %4728 = vrcp.f32 %v1188_v12 }
 0x4eb   :  { %v1191_v13 = vpop.xlane.xlu1 %1190 }
 0x4ec   :  { %4730 = vrcp.f32 %v1191_v13 }
 0x4f6   :  { %v4729_v18 = vpop.eup %4728 }
 0x4f7   :  { %v1194_v20 = vmul.f32 %v4729_v18, %v4725_v8 }
 0x4f9   :  { %v4731_v23 = vpop.eup %4730  ;;  %4469 = vmatmul.mubr.msk.f32.vlgmr.msra.gmra.mxu0 %vm523_vm6, %v1194_v20 }
 0x4fa   :  { %4477 = vmatpush3.xpose.msk.msra.mxu0 %vm104_vm0, %v4999_v28  ;;  %4478 = vmatprep.mubr.msk.f32.mxu0 %vm4837_vm1, %v4836_v17  ;;  %v1195_v24 = vmul.f32 %v4731_v23, %v4727_v10  ;;  %v1352_v28 = vmul.f32 %v5132_v22, %v5007_v30 }
 0x4fb   :  { %4486 = vmatprep.subr.mxu0 %v4836_v17 }
 0x4fc   :  { %4474 = vmatmul.mubr.msk.f32.vlgmr.msra.gmra.mxu1 %vm523_vm6, %v1195_v24 }
 0x4fd   :  { %4479 = vmatmul.mubr.msk.f32.vlgmr.msra.gmra.mxu0 %vm104_vm0, %v1351_v26  ;;  %4482 = vmatpush3.xpose.msk.msra.mxu1 %vm104_vm0, %v5010_v31 }
 0x4fe   :  { %4487 = vmatpush3.msra.mxu0 %v1523_v19  ;;  %4483 = vmatprep.mubr.msk.f32.mxu1 %vm4837_vm1, %v4836_v17 }
 0x4ff   :  { %4491 = vmatprep.subr.mxu1 %v4836_v17  ;;  %4488 = vmatprep.mubr.msk.f32.mxu0 %vm4837_vm1, %v4836_v17 }
 0x500   :  { %4484 = vmatmul.mubr.msk.f32.vlgmr.msra.gmra.mxu1 %vm104_vm0, %v1352_v28  ;;  %4496 = vmatprep.subr.mxu0 %v1676_v53 }
 0x501   :  { %4492 = vmatpush3.msra.mxu1 %v1524_v27  ;;  %4493 = vmatprep.mubr.msk.f32.mxu1 %vm4837_vm1, %v4836_v17 }
 0x5b9   :  { %v1267_v31 = vpop.f32.mrf.mxu0 }
 0x5ba   :  { %v1344_v30 = vadd.f32 %v1267_v31, %v943_v52 }
 0x5bb   :  { %v4470_v21 = vpop.f32.mrf.mxu0 }
 0x5bc   :  { %v1340_v29 = vpop.f32.mrf.mxu1  ;;  %v1813_v21 = vld [vmem:[#allocation5 + $0x8] sm:$0xff] }
 0x5bd   :  { %v1345_v32 = vadd.f32 %v1340_v29, %v1016_v56  ;;  %v1422_v34 = vpop.f32.mrf.mxu0  ;;  %v1812_v29 = vld [vmem:[#allocation5] sm:$0xff] }
 0x5be   :  { %v1499_v35 = vmul.f32 0.35355338, %v1422_v34  ;;  %v4475_v36 = vpop.f32.mrf.mxu1  ;;  %v1912_v34 = vld [vmem:[%s5519_s10 + $0x30] sm:$0xff] }
 0x5bf   :  { %v4480_v37 = vpop.f32.mrf.mxu0  ;;  %v1910_v36 = vld [vmem:[%s5519_s10 + $0x20] sm:$0xff] }
 0x5c0   :  { %v1501_v14 = vsel %vm523_vm6, %v1499_v35, -inf  ;;  %v1495_v38 = vpop.f32.mrf.mxu1 }
 0x5c1   :  { %1502 = vmax.xlane.f32.xlu0 %v1501_v14  ;;  %v1500_v39 = vmul.f32 0.35355338, %v1495_v38 }
 0x5c2   :  { %v4485_v40 = vpop.f32.mrf.mxu1 }
 0x5c3   :  { %v1504_v42 = vsel %vm523_vm6, %v1500_v39, -inf }
 0x5c4   :  { %1505 = vmax.xlane.f32.xlu1 %v1504_v42 }
 0x64a   :  { %v1503_v43 = vpop.xlane.xlu0 %1502 }
 0x64b   :  { %v1507_v44 = vsub.f32 %v1499_v35, %v1503_v43  ;;  %v1911_v35 = vld [vmem:[%s5519_s10 + $0x28] sm:$0xff] }
 0x64d   :  { %v1509_v45 = vmul.f32 1.442695, %v1507_v44  ;;  %v1506_v46 = vpop.xlane.xlu1 %1505  ;;  %v4144_v44 = vld [vmem:[%s5515_s6] ss:$0 sm:$0xff] }
 0x64e   :  { %v1508_v47 = vsub.f32 %v1500_v39, %v1506_v46 }
 0x64f   :  { %4732 = vpow2.f32 %v1509_v45 }
 0x650   :  { %v1511_v48 = vmul.f32 1.442695, %v1508_v47 }
 0x652   :  { %4734 = vpow2.f32 %v1511_v48 }
 0x65c   :  { %v4733_v49 = vpop.eup %4732 }
 0x65d   :  { %v1513_v50 = vsel %vm523_vm6, %v4733_v49, 0.0 }
 0x65e   :  { %1514 = vadd.xlane.f32.xlu0 %v1513_v50 }
 0x65f   :  { %v4735_v51 = vpop.eup %4734 }
 0x660   :  { %v1516_v52 = vsel %vm523_vm6, %v4735_v51, 0.0 }
 0x661   :  { %1517 = vadd.xlane.f32.xlu1 %v1516_v52 }
 0x6e7   :  { %v1515_v54 = vpop.xlane.xlu0 %1514 }
 0x6e8   :  { %4736 = vrcp.f32 %v1515_v54  ;;  %v1908_v54 = vld [vmem:[%s5519_s10 + $0x10] sm:$0xff] }
 0x6ea   :  { %v1518_v55 = vpop.xlane.xlu1 %1517 }
 0x6eb   :  { %4738 = vrcp.f32 %v1518_v55  ;;  %v1907_v55 = vld [vmem:[%s5519_s10 + $0x8] sm:$0xff] }
 0x6f5   :  { %v4737_v56 = vpop.eup %4736 }
 0x6f6   :  { %v1521_v57 = vmul.f32 %v4737_v56, %v4733_v49  ;;  %v4145_v49 = vld [vmem:[%s5516_s7] ss:$0 sm:$0xff] }
 0x6f7   :  { %v1906_v56 = vld [vmem:[%s5519_s10] sm:$0xff] }
 0x6f8   :  { %v4739_v58 = vpop.eup %4738  ;;  %4489 = vmatmul.mubr.msk.f32.vlgmr.msra.gmra.mxu0 %vm523_vm6, %v1521_v57  ;;  %v4146_v57 = vld [vmem:[%s5518_s9] ss:$0 sm:$0xff] }
 0x6f9   :  { %v1522_v59 = vmul.f32 %v4739_v58, %v4735_v51  ;;  %4497 = vmatpush3.msra.mxu0 %v1676_v53  ;;  %v1909_v53 = vld [vmem:[%s5519_s10 + $0x18] sm:$0xff] }
 0x6fa   :  { %4498 = vmatprep.subr.mxu0 %v1675_v60 }
 0x6fb   :  { %4494 = vmatmul.mubr.msk.f32.vlgmr.msra.gmra.mxu1 %vm523_vm6, %v1522_v59  ;;  %4499 = vmatpush3.msra.mxu0 %v1675_v60 }
 0x6fc   :  { %4500 = vmatprep.subr.mxu0 %v1674_v61 }
 0x6fd   :  { %4501 = vmatpush3.msra.mxu0 %v1674_v61 }
 0x6fe   :  { %4502 = vmatprep.subr.mxu0 %v1673_v62 }
 0x6ff   :  { %4503 = vmatpush3.msra.mxu0 %v1673_v62 }
 0x7b8   :  { %v1594_v63 = vpop.f32.mrf.mxu0 }
 0x7b9   :  { %v1671_v0 = vadd.f32 %v1594_v63, %v1344_v30  ;;  %v1815_v30 = vld [vmem:[#allocation5 + $0x18] sm:$0xff] }
 0x7ba   :  { %v4490_v1 = vpop.f32.mrf.mxu0  ;;  %4507 = vmatprep.subr.mxu1 %v1815_v30 }
 0x7bb   :  { %4504 = vmatprep.mubr.msk.f32.mxu0 %vm104_vm0, %v1671_v0  ;;  %v1667_v2 = vpop.f32.mrf.mxu1  ;;  %4508 = vmatpush3.msra.mxu1 %v1815_v30  ;;  %v4149_v0 = vld [vmem:[%s5520_s11] ss:$0 sm:$0xff]  ;;  %v4171_v30 = vld [vmem:[%s5511_s2 + $0xa8] sm:$0xff] }
 0x7bc   :  { %v1672_v3 = vadd.f32 %v1667_v2, %v1345_v32  ;;  %v1913_v32 = vld [vmem:[%s5519_s10 + $0x38] sm:$0xff] }
 0x7bd   :  { %v4495_v4 = vpop.f32.mrf.mxu1  ;;  %4518 = vmatprep.subr.mxu0 %v1913_v32 }
 0x7be   :  { %4505 = vmatmul.mubr.msk.f32.vlgmr.msra.gmra.mxu0 %vm104_vm0, %v1672_v3 }
 0x7bf   :  { %4519 = vmatpush3.msra.mxu0 %v1913_v32 }
 0x7c0   :  { %4520 = vmatprep.subr.mxu0 %v1912_v34 }
 0x7c1   :  { %4521 = vmatpush3.msra.mxu0 %v1912_v34 }
 0x7c2   :  { %4522 = vmatprep.subr.mxu0 %v1911_v35 }
 0x7c3   :  { %4523 = vmatpush3.msra.mxu0 %v1911_v35 }
 0x7c4   :  { %4524 = vmatprep.subr.mxu0 %v1910_v36 }
 0x7c5   :  { %4525 = vmatpush3.msra.mxu0 %v1910_v36 }
 0x7c6   :  { %4526 = vmatprep.subr.mxu0 %v1909_v53 }
 0x7c7   :  { %4527 = vmatpush3.msra.mxu0 %v1909_v53 }
 0x7c8   :  { %4528 = vmatprep.subr.mxu0 %v1908_v54 }
 0x7c9   :  { %4529 = vmatpush3.msra.mxu0 %v1908_v54 }
 0x7ca   :  { %4530 = vmatprep.subr.mxu0 %v1907_v55 }
 0x7cb   :  { %4531 = vmatpush3.msra.mxu0 %v1907_v55 }
 0x7cc   :  { %4532 = vmatprep.subr.mxu0 %v1906_v56 }
 0x7cd   :  { %4533 = vmatpush3.msra.mxu0 %v1906_v56 }
 0x87e   :  { %v4506_v6 = vpop.f32.mrf.mxu0 }
 0x87f   :  { %v1762_v7 = vadd.f32 %v4506_v6, %v4141_v5 }
 0x880   :  { %v1756_v8 = vpop.f32.mrf.mxu0 }
 0x881   :  { %v1757_v9 = vadd.f32 %v4141_v5, %v1756_v8  ;;  %v1766_v10 = vadd.f32 %v1762_v7, %v4970_v16 }
 0x883   :  { %v1772_v11 = vsel %vm104_vm0, %v1766_v10, 0.0  ;;  %v1765_v12 = vadd.f32 %v1757_v9, %v4968_v15  ;;  %v1814_v15 = vld [vmem:[#allocation5 + $0x10] sm:$0xff] }
 0x884   :  { %1773 = vadd.xlane.f32.xlu1 %v1772_v11  ;;  %4509 = vmatprep.subr.mxu1 %v1814_v15 }
 0x885   :  { %v1769_v13 = vsel %vm104_vm0, %v1765_v12, 0.0  ;;  %4510 = vmatpush3.msra.mxu1 %v1814_v15  ;;  %v4154_v15 = vld [vmem:[%s5511_s2 + $0x60] sm:$0xff] }
 0x886   :  { %1770 = vadd.xlane.f32.xlu0 %v1769_v13  ;;  %4511 = vmatprep.subr.mxu1 %v1813_v21 }
 0x887   :  { %4512 = vmatpush3.msra.mxu1 %v1813_v21  ;;  %v4170_v21 = vld [vmem:[%s5511_s2 + $0xa0] sm:$0xff] }
 0x888   :  { %4513 = vmatprep.subr.mxu1 %v1812_v29 }
 0x889   :  { %4514 = vmatpush3.msra.mxu1 %v1812_v29  ;;  %v4165_v29 = vld [vmem:[%s5511_s2 + $0x98] sm:$0xff] }
 0x90d   :  { %v1774_v18 = vpop.xlane.xlu1 %1773 }
 0x90e   :  { %v1777_v20 = vmul.f32 0.03125, %v1774_v18 }
 0x90f   :  { %v1771_v23 = vpop.xlane.xlu0 %1770 }
 0x910   :  { %v1779_v24 = vsub.f32 %v1766_v10, %v1777_v20  ;;  %v1776_v26 = vmul.f32 0.03125, %v1771_v23 }
 0x912   :  { %v1778_v19 = vsub.f32 %v1765_v12, %v1776_v26  ;;  %v1781_v28 = vmul.f32 %v1779_v24, %v1779_v24 }
 0x914   :  { %v1785_v27 = vsel %vm104_vm0, %v1781_v28, 0.0  ;;  %v1780_v31 = vmul.f32 %v1778_v19, %v1778_v19  ;;  %v4173_v28 = vld [vmem:[%s5511_s2 + $0xb8] sm:$0xff] }
 0x915   :  { %1786 = vadd.xlane.f32.xlu1 %v1785_v27  ;;  %v4156_v27 = vld [vmem:[%s5511_s2 + $0x70] sm:$0xff]  ;;  %4559 = vmatprep.subr.mxu0 %v4173_v28 }
 0x916   :  { %v1782_v16 = vsel %vm104_vm0, %v1780_v31, 0.0  ;;  %v4172_v31 = vld [vmem:[%s5511_s2 + $0xb0] sm:$0xff] }
 0x917   :  { %1783 = vadd.xlane.f32.xlu0 %v1782_v16  ;;  %v4155_v16 = vld [vmem:[%s5511_s2 + $0x68] sm:$0xff] }
 0x99e   :  { %v1787_v37 = vpop.xlane.xlu1 %1786 }
 0x99f   :  { %v1789_v14 = vmul.f32 0.03125, %v1787_v37 }
 0x9a0   :  { %v1784_v38 = vpop.xlane.xlu0 %1783 }
 0x9a1   :  { %v1791_v39 = vadd.f32 1e-05, %v1789_v14  ;;  %v1788_v40 = vmul.f32 0.03125, %v1784_v38 }
 0x9a3   :  { %4740 = vrsqrt.f32 %v1791_v39  ;;  %v1790_v42 = vadd.f32 1e-05, %v1788_v40  ;;  %v4152_v39 = vld [vmem:[%s5521_s12] ss:$0 sm:$0xff] }
 0x9a5   :  { %4742 = vrsqrt.f32 %v1790_v42 }
 0x9b0   :  { %v4741_v43 = vpop.eup %4740 }
 0x9b1   :  { %v1795_v45 = vmul.f32 %v4741_v43, %v1779_v24 }
 0x9b2   :  { %v4743_v46 = vpop.eup %4742 }
 0x9b3   :  { %v1794_v47 = vmul.f32 %v4743_v46, %v1778_v19  ;;  %v1803_v48 = vmul.f32 %v4144_v44, %v1795_v45  ;;  %v4157_v19 = vld [vmem:[%s5511_s2 + $0x78] sm:$0xff]  ;;  %v4153_v45 = vld [vmem:[%s5522_s13] ss:$0 sm:$0xff] }
 0x9b4   :  { %4537 = vmatprep.subr.mxu1 %v4157_v19 }
 0x9b5   :  { %v1802_v50 = vmul.f32 %v4144_v44, %v1794_v47  ;;  %v1811_v52 = vadd.f32 %v4145_v49, %v1803_v48 }
 0x9b7   :  { %v1810_v51 = vadd.f32 %v4145_v49, %v1802_v50  ;;  %v4164_v49 = vld [vmem:[%s5511_s2 + $0x90] sm:$0xff]  ;;  %v4163_v50 = vld [vmem:[%s5511_s2 + $0x88] sm:$0xff] }
 0x9b9   :  { %4515 = vmatprep.mubr.msk.f32.mxu1 %vm104_vm0, %v1810_v51 }
 0x9ba   :  { %4516 = vmatmul.mubr.msk.f32.vlgmr.msra.gmra.mxu1 %vm104_vm0, %v1811_v52 }
 0x9bb   :  { %4538 = vmatpush3.msra.mxu1 %v4157_v19 }
 0x9bc   :  { %4539 = vmatprep.subr.mxu1 %v4156_v27 }
 0x9bd   :  { %4540 = vmatpush3.msra.mxu1 %v4156_v27 }
 0x9be   :  { %4541 = vmatprep.subr.mxu1 %v4155_v16 }
 0x9bf   :  { %4542 = vmatpush3.msra.mxu1 %v4155_v16 }
 0x9c0   :  { %4543 = vmatprep.subr.mxu1 %v4154_v15 }
 0x9c1   :  { %4544 = vmatpush3.msra.mxu1 %v4154_v15 }
 0x9c2   :  { %4548 = vmatprep.subr.mxu1 %v4165_v29 }
 0xa7a   :  { %v4517_v58 = vpop.f32.mrf.mxu1 }
 0xa7b   :  { %v1901_v59 = vadd.f32 %v4517_v58, %v4146_v57  ;;  %v4175_v58 = vld [vmem:[%s5512_s3 + $0x5] ss:$0 sm:$0xff] }
 0xa7c   :  { %v1895_v60 = vpop.f32.mrf.mxu1 }
 0xa7d   :  { %v1896_v61 = vadd.f32 %v4146_v57, %v1895_v60  ;;  %v1905_v63 = vmax.f32 %v1901_v59, 0.0  ;;  %v4159_v57 = vld [vmem:[%s5512_s3 + $0x3] ss:$0 sm:$0xff]  ;;  %v4167_v60 = vld [vmem:[%s5512_s3 + $0x4] ss:$0 sm:$0xff] }
 0xa7f   :  { %v1904_v62 = vmax.f32 %v1896_v61, 0.0 }
 0xa81   :  { %4534 = vmatprep.mubr.msk.f32.mxu0 %vm1921_vm13, %v1904_v62 }
 0xa82   :  { %4535 = vmatmul.mubr.msk.f32.vlgmr.msra.gmra.mxu0 %vm1921_vm13, %v1905_v63 }
 0xa83   :  { %4560 = vmatpush3.msra.mxu0 %v4173_v28 }
 0xa84   :  { %4561 = vmatprep.subr.mxu0 %v4172_v31 }
 0xa85   :  { %4562 = vmatpush3.msra.mxu0 %v4172_v31 }
 0xa86   :  { %4563 = vmatprep.subr.mxu0 %v4171_v30 }
 0xa87   :  { %4564 = vmatpush3.msra.mxu0 %v4171_v30 }
 0xa88   :  { %4565 = vmatprep.subr.mxu0 %v4170_v21 }
 0xa89   :  { %4566 = vmatpush3.msra.mxu0 %v4170_v21 }
 0xa8a   :  { %4580 = vmatprep.subr.mxu0 %v4836_v17 }
 0xb42   :  { %v4536_v1 = vpop.f32.mrf.mxu0 }
 0xb43   :  { %v2000_v2 = vadd.f32 %v4536_v1, %v4149_v0 }
 0xb44   :  { %v1994_v3 = vpop.f32.mrf.mxu0 }
 0xb45   :  { %v1995_v4 = vadd.f32 %v4149_v0, %v1994_v3  ;;  %v2004_v5 = vadd.f32 %v2000_v2, %v1811_v52 }
 0xb47   :  { %v2010_v6 = vsel %vm104_vm0, %v2004_v5, 0.0  ;;  %v2003_v7 = vadd.f32 %v1995_v4, %v1810_v51  ;;  %v4162_v51 = vld [vmem:[%s5511_s2 + $0x80] sm:$0xff] }
 0xb48   :  { %2011 = vadd.xlane.f32.xlu1 %v2010_v6 }
 0xb49   :  { %v2007_v8 = vsel %vm104_vm0, %v2003_v7, 0.0 }
 0xb4a   :  { %2008 = vadd.xlane.f32.xlu0 %v2007_v8 }
 0xbd1   :  { %v2012_v9 = vpop.xlane.xlu1 %2011 }
 0xbd2   :  { %v2014_v10 = vmul.f32 0.03125, %v2012_v9 }
 0xbd3   :  { %v2009_v11 = vpop.xlane.xlu0 %2008 }
 0xbd4   :  { %v2016_v12 = vsub.f32 %v2004_v5, %v2014_v10  ;;  %v2013_v13 = vmul.f32 0.03125, %v2009_v11 }
 0xbd6   :  { %v2015_v18 = vsub.f32 %v2003_v7, %v2013_v13  ;;  %v2018_v20 = vmul.f32 %v2016_v12, %v2016_v12 }
 0xbd8   :  { %v2022_v23 = vsel %vm104_vm0, %v2018_v20, 0.0  ;;  %v2017_v24 = vmul.f32 %v2015_v18, %v2015_v18 }
 0xbd9   :  { %2023 = vadd.xlane.f32.xlu1 %v2022_v23 }
 0xbda   :  { %v2019_v26 = vsel %vm104_vm0, %v2017_v24, 0.0 }
 0xbdb   :  { %2020 = vadd.xlane.f32.xlu0 %v2019_v26 }
 0xc62   :  { %v2024_v32 = vpop.xlane.xlu1 %2023 }
 0xc63   :  { %v2026_v34 = vmul.f32 0.03125, %v2024_v32 }
 0xc64   :  { %v2021_v35 = vpop.xlane.xlu0 %2020 }
 0xc65   :  { %v2028_v36 = vadd.f32 1e-05, %v2026_v34  ;;  %v2025_v37 = vmul.f32 0.03125, %v2021_v35 }
 0xc67   :  { %4744 = vrsqrt.f32 %v2028_v36  ;;  %v2027_v14 = vadd.f32 1e-05, %v2025_v37 }
 0xc69   :  { %4746 = vrsqrt.f32 %v2027_v14 }
 0xc74   :  { %v4745_v38 = vpop.eup %4744 }
 0xc75   :  { %v2032_v40 = vmul.f32 %v4745_v38, %v2016_v12 }
 0xc76   :  { %v4747_v42 = vpop.eup %4746 }
 0xc77   :  { %v2031_v43 = vmul.f32 %v4747_v42, %v2015_v18  ;;  %v2040_v44 = vmul.f32 %v4152_v39, %v2032_v40 }
 0xc79   :  { %v2039_v46 = vmul.f32 %v4152_v39, %v2031_v43  ;;  %v5257_v48 = vadd.f32 %v4153_v45, %v2040_v44 }
 0xc7b   :  { %v5255_v47 = vadd.f32 %v4153_v45, %v2039_v46 }
 0xc7d   :  { %4545 = vmatprep.mubr.msk.f32.mxu1 %vm104_vm0, %v5255_v47  ;;  %4567 = vmatprep.mubr.msk.f32.mxu0 %vm104_vm0, %v5255_v47 }
 0xc7e   :  { %4546 = vmatmul.mubr.msk.f32.vlgmr.msra.gmra.mxu1 %vm104_vm0, %v5257_v48  ;;  %4568 = vmatmul.mubr.msk.f32.vlgmr.msra.gmra.mxu0 %vm104_vm0, %v5257_v48 }
 0xc7f   :  { %4549 = vmatpush3.msra.mxu1 %v4165_v29  ;;  %4556 = vmatprep.mubr.msk.f32.mxu1 %vm104_vm0, %v5255_v47 }
 0xc80   :  { %4550 = vmatprep.subr.mxu1 %v4164_v49  ;;  %4582 = vmatprep.mubr.msk.f32.mxu0 %vm4837_vm1, %v4836_v17 }
 0xc81   :  { %4551 = vmatpush3.msra.mxu1 %v4164_v49 }
 0xc82   :  { %4552 = vmatprep.subr.mxu1 %v4163_v50 }
 0xc83   :  { %4553 = vmatpush3.msra.mxu1 %v4163_v50 }
 0xc84   :  { %4554 = vmatprep.subr.mxu1 %v4162_v51 }
 0xc85   :  { %4555 = vmatpush3.msra.mxu1 %v4162_v51 }
 0xc86   :  { %4557 = vmatmul.mubr.msk.f32.vlgmr.msra.gmra.mxu1 %vm104_vm0, %v5257_v48  ;;  %4570 = vmatprep.subr.mxu1 %v4836_v17 }
 0xc87   :  { %4572 = vmatprep.mubr.msk.f32.mxu1 %vm4837_vm1, %v4836_v17 }
 0xd3e   :  { %v4547_v52 = vpop.f32.mrf.mxu1  ;;  %v4569_v53 = vpop.f32.mrf.mxu0 }
 0xd3f   :  { %v5304_v0 = vadd.f32 %v4547_v52, %v4159_v57  ;;  %v5325_v6 = vadd.f32 %v4569_v53, %v4175_v58 }
 0xd40   :  { %v2134_v54 = vpop.f32.mrf.mxu1  ;;  %v2310_v55 = vpop.f32.mrf.mxu0 }
 0xd41   :  { %v5291_v59 = vadd.f32 %v4159_v57, %v2134_v54  ;;  %v5296_v62 = vadd.f32 %v4175_v58, %v2310_v55  ;;  %v2320_v5 = vmul.f32 %v4992_v25, %v5304_v0  ;;  %v2500_v7 = vmul.f32 %v5021_v33, %v5304_v0 }
 0xd42   :  { %v2672_v8 = vmul.f32 %v5021_v33, %v5325_v6 }
 0xd43   :  { %v2319_v1 = vmul.f32 %v4992_v25, %v5291_v59  ;;  %v2499_v2 = vmul.f32 %v5021_v33, %v5291_v59  ;;  %v2671_v4 = vmul.f32 %v5021_v33, %v5296_v62  ;;  %v2497_v57 = vmul.f32 %v4992_v25, %v5296_v62 }
 0xd46   :  { %v4558_v56 = vpop.f32.mrf.mxu1 }
 0xd47   :  { %v5312_v3 = vadd.f32 %v4558_v56, %v4167_v60 }
 0xd48   :  { %v2222_v61 = vpop.f32.mrf.mxu1 }
 0xd49   :  { %v5298_v63 = vadd.f32 %v4167_v60, %v2222_v61 }
 0xd4b   :  { %4571 = vmatpush3.xpose.msk.msra.mxu1 %vm104_vm0, %v5298_v63  ;;  %4581 = vmatpush3.xpose.msk.msra.mxu0 %vm104_vm0, %v5298_v63 }
 0xd4c   :  { %4575 = vmatprep.subr.mxu1 %v4836_v17  ;;  %4590 = vmatprep.subr.mxu0 %v4836_v17 }
 0xd4e   :  { %4573 = vmatmul.mubr.msk.f32.vlgmr.msra.gmra.mxu1 %vm104_vm0, %v2319_v1  ;;  %4583 = vmatmul.mubr.msk.f32.vlgmr.msra.gmra.mxu0 %vm104_vm0, %v2499_v2  ;;  %v2965_v1 = vmul.f32 %v5091_v41, %v5291_v59 }
 0xd4f   :  { %4576 = vmatpush3.xpose.msk.msra.mxu1 %vm104_vm0, %v5312_v3  ;;  %4591 = vmatpush3.msra.mxu0 %v2671_v4  ;;  %v2498_v4 = vmul.f32 %v4992_v25, %v5325_v6  ;;  %v2966_v25 = vmul.f32 %v5091_v41, %v5304_v0 }
 0xd50   :  { %4577 = vmatprep.mubr.msk.f32.mxu1 %vm4837_vm1, %v4836_v17  ;;  %4585 = vmatprep.subr.mxu1 %v4836_v17 }
 0xd51   :  { %4592 = vmatprep.mubr.msk.f32.mxu0 %vm4837_vm1, %v4836_v17  ;;  %4600 = vmatprep.subr.mxu0 %v4836_v17 }
 0xd52   :  { %4578 = vmatmul.mubr.msk.f32.vlgmr.msra.gmra.mxu1 %vm104_vm0, %v2320_v5  ;;  %v3137_v5 = vmul.f32 %v5091_v41, %v5296_v62 }
 0xd53   :  { %4586 = vmatpush3.xpose.msk.msra.mxu1 %vm104_vm0, %v5312_v3  ;;  %4587 = vmatprep.mubr.msk.f32.mxu1 %vm4837_vm1, %v4836_v17 }
 0xd54   :  { %4595 = vmatprep.subr.mxu1 %v4836_v17 }
 0xd56   :  { %4588 = vmatmul.mubr.msk.f32.vlgmr.msra.gmra.mxu1 %vm104_vm0, %v2500_v7 }
 0xd57   :  { %4596 = vmatpush3.msra.mxu1 %v2672_v8  ;;  %4597 = vmatprep.mubr.msk.f32.mxu1 %vm4837_vm1, %v4836_v17 }
 0xd58   :  { %4605 = vmatprep.subr.mxu1 %v4836_v17 }
 0xe0e   :  { %v2393_v9 = vpop.f32.mrf.mxu1  ;;  %v2570_v10 = vpop.f32.mrf.mxu0 }
 0xe0f   :  { %v2647_v11 = vmul.f32 0.35355338, %v2570_v10  ;;  %v2473_v18 = vmul.f32 0.35355338, %v2393_v9  ;;  %v3138_v9 = vmul.f32 %v5091_v41, %v5325_v6 }
 0xe10   :  { %v4574_v12 = vpop.f32.mrf.mxu1  ;;  %v4584_v13 = vpop.f32.mrf.mxu0 }
 0xe11   :  { %v2649_v20 = vsel %vm523_vm6, %v2647_v11, -inf  ;;  %v2475_v33 = vsel %vm523_vm6, %v2473_v18, -inf }
 0xe12   :  { %2650 = vmax.xlane.f32.xlu0 %v2649_v20  ;;  %v2469_v23 = vpop.f32.mrf.mxu1 }
 0xe13   :  { %v2474_v27 = vmul.f32 0.35355338, %v2469_v23 }
 0xe14   :  { %v4579_v24 = vpop.f32.mrf.mxu1 }
 0xe15   :  { %v2478_v16 = vsel %vm523_vm6, %v2474_v27, -inf }
 0xe16   :  { %2476 = vmax.xlane.f32.xlu0 %v2475_v33  ;;  %v2643_v26 = vpop.f32.mrf.mxu1 }
 0xe17   :  { %v2648_v19 = vmul.f32 0.35355338, %v2643_v26 }
 0xe18   :  { %v4589_v28 = vpop.f32.mrf.mxu1 }
 0xe19   :  { %v2652_v31 = vsel %vm523_vm6, %v2648_v19, -inf }
 0xe1a   :  { %2653 = vmax.xlane.f32.xlu1 %v2652_v31 }
 0xe1e   :  { %2479 = vmax.xlane.f32.xlu1 %v2478_v16 }
 0xe9b   :  { %v2651_v30 = vpop.xlane.xlu0 %2650 }
 0xe9c   :  { %v2655_v15 = vsub.f32 %v2647_v11, %v2651_v30 }
 0xe9e   :  { %v2657_v21 = vmul.f32 1.442695, %v2655_v15 }
 0xe9f   :  { %v2477_v29 = vpop.xlane.xlu0 %2476 }
 0xea0   :  { %4748 = vpow2.f32 %v2657_v21  ;;  %v2481_v32 = vsub.f32 %v2473_v18, %v2477_v29 }
 0xea2   :  { %v2483_v34 = vmul.f32 1.442695, %v2481_v32 }
 0xea3   :  { %v2654_v35 = vpop.xlane.xlu1 %2653 }
 0xea4   :  { %4750 = vpow2.f32 %v2483_v34  ;;  %v2656_v36 = vsub.f32 %v2648_v19, %v2654_v35 }
 0xea6   :  { %v2659_v37 = vmul.f32 1.442695, %v2656_v36 }
 0xea7   :  { %v2480_v14 = vpop.xlane.xlu1 %2479 }
 0xea8   :  { %4752 = vpow2.f32 %v2659_v37  ;;  %v2482_v38 = vsub.f32 %v2474_v27, %v2480_v14 }
 0xeaa   :  { %v2485_v39 = vmul.f32 1.442695, %v2482_v38 }
 0xeac   :  { %4754 = vpow2.f32 %v2485_v39 }
 0xead   :  { %v4749_v40 = vpop.eup %4748 }
 0xeae   :  { %v2661_v42 = vsel %vm523_vm6, %v4749_v40, 0.0 }
 0xeaf   :  { %2662 = vadd.xlane.f32.xlu0 %v2661_v42 }
 0xeb1   :  { %v4751_v43 = vpop.eup %4750 }
 0xeb2   :  { %v2487_v44 = vsel %vm523_vm6, %v4751_v43, 0.0 }
 0xeb3   :  { %2488 = vadd.xlane.f32.xlu0 %v2487_v44 }
 0xeb5   :  { %v4753_v45 = vpop.eup %4752 }
 0xeb6   :  { %v2664_v46 = vsel %vm523_vm6, %v4753_v45, 0.0 }
 0xeb7   :  { %2665 = vadd.xlane.f32.xlu1 %v2664_v46  ;;  %v3459_v46 = vmul.f32 %v5132_v22, %v5296_v62  ;;  %v3460_v62 = vmul.f32 %v5132_v22, %v5325_v6 }
 0xeb9   :  { %v4755_v49 = vpop.eup %4754 }
 0xeba   :  { %v2490_v50 = vsel %vm523_vm6, %v4755_v49, 0.0 }
 0xebb   :  { %2491 = vadd.xlane.f32.xlu1 %v2490_v50 }
 0xf38   :  { %v2663_v51 = vpop.xlane.xlu0 %2662 }
 0xf39   :  { %4756 = vrcp.f32 %v2663_v51 }
 0xf3c   :  { %v2489_v52 = vpop.xlane.xlu0 %2488 }
 0xf3d   :  { %4758 = vrcp.f32 %v2489_v52 }
 0xf40   :  { %v2666_v53 = vpop.xlane.xlu1 %2665 }
 0xf41   :  { %4760 = vrcp.f32 %v2666_v53 }
 0xf44   :  { %v2492_v54 = vpop.xlane.xlu1 %2491 }
 0xf45   :  { %4762 = vrcp.f32 %v2492_v54 }
 0xf46   :  { %v4757_v55 = vpop.eup %4756 }
 0xf47   :  { %v2669_v56 = vmul.f32 %v4757_v55, %v4749_v40 }
 0xf49   :  { %4593 = vmatmul.mubr.msk.f32.vlgmr.msra.gmra.mxu0 %vm523_vm6, %v2669_v56 }
 0xf4a   :  { %v4759_v58 = vpop.eup %4758  ;;  %4601 = vmatpush3.msra.mxu0 %v2497_v57  ;;  %4602 = vmatprep.mubr.msk.f32.mxu0 %vm4837_vm1, %v4836_v17 }
 0xf4b   :  { %4610 = vmatprep.subr.mxu0 %v4836_v17  ;;  %v2495_v60 = vmul.f32 %v4759_v58, %v4751_v43 }
 0xf4d   :  { %4603 = vmatmul.mubr.msk.f32.vlgmr.msra.gmra.mxu0 %vm523_vm6, %v2495_v60 }
 0xf4e   :  { %v4761_v61 = vpop.eup %4760  ;;  %4611 = vmatpush3.xpose.msk.msra.mxu0 %vm104_vm0, %v5298_v63  ;;  %4612 = vmatprep.mubr.msk.f32.mxu0 %vm4837_vm1, %v4836_v17 }
 0xf4f   :  { %4620 = vmatprep.subr.mxu0 %v4836_v17  ;;  %v2670_v2 = vmul.f32 %v4761_v61, %v4753_v45  ;;  %v3287_v45 = vmul.f32 %v5132_v22, %v5291_v59  ;;  %v3288_v59 = vmul.f32 %v5132_v22, %v5304_v0 }
 0xf51   :  { %4598 = vmatmul.mubr.msk.f32.vlgmr.msra.gmra.mxu1 %vm523_vm6, %v2670_v2  ;;  %4613 = vmatmul.mubr.msk.f32.vlgmr.msra.gmra.mxu0 %vm104_vm0, %v2965_v1 }
 0xf52   :  { %v4763_v7 = vpop.eup %4762  ;;  %4606 = vmatpush3.msra.mxu1 %v2498_v4  ;;  %4621 = vmatpush3.msra.mxu0 %v3137_v5 }
 0xf53   :  { %4607 = vmatprep.mubr.msk.f32.mxu1 %vm4837_vm1, %v4836_v17  ;;  %4615 = vmatprep.subr.mxu1 %v4836_v17  ;;  %v2496_v8 = vmul.f32 %v4763_v7, %v4755_v49 }
 0xf54   :  { %4622 = vmatprep.mubr.msk.f32.mxu0 %vm4837_vm1, %v4836_v17  ;;  %4630 = vmatprep.subr.mxu0 %v4836_v17 }
 0xf55   :  { %4608 = vmatmul.mubr.msk.f32.vlgmr.msra.gmra.mxu1 %vm523_vm6, %v2496_v8 }
 0xf56   :  { %4616 = vmatpush3.xpose.msk.msra.mxu1 %vm104_vm0, %v5312_v3  ;;  %4617 = vmatprep.mubr.msk.f32.mxu1 %vm4837_vm1, %v4836_v17 }
 0xf57   :  { %4625 = vmatprep.subr.mxu1 %v4836_v17 }
 0xf59   :  { %4618 = vmatmul.mubr.msk.f32.vlgmr.msra.gmra.mxu1 %vm104_vm0, %v2966_v25 }
 0xf5a   :  { %4626 = vmatpush3.msra.mxu1 %v3138_v9  ;;  %4627 = vmatprep.mubr.msk.f32.mxu1 %vm4837_vm1, %v4836_v17 }
 0xf5b   :  { %4635 = vmatprep.subr.mxu1 %v4836_v17 }
0x1009   :  { %v2742_v10 = vpop.f32.mrf.mxu0 }
0x100b   :  { %v4594_v11 = vpop.f32.mrf.mxu0 }
0x100d   :  { %v2888_v12 = vpop.f32.mrf.mxu0 }
0x100e   :  { %v2889_v13 = vadd.f32 %v2888_v12, %v2742_v10 }
0x100f   :  { %v4604_v18 = vpop.f32.mrf.mxu0 }
0x1011   :  { %v2815_v20 = vpop.f32.mrf.mxu1  ;;  %v3036_v23 = vpop.f32.mrf.mxu0 }
0x1012   :  { %v3113_v24 = vmul.f32 0.35355338, %v3036_v23  ;;  %v3613_v23 = vld [vmem:[#allocation3 + $0x38] sm:$0xff] }
0x1013   :  { %v4599_v33 = vpop.f32.mrf.mxu1  ;;  %v4614_v26 = vpop.f32.mrf.mxu0 }
0x1014   :  { %v3115_v41 = vsel %vm523_vm6, %v3113_v24, -inf  ;;  %v3611_v33 = vld [vmem:[#allocation3 + $0x28] sm:$0xff]  ;;  %v3610_v26 = vld [vmem:[#allocation3 + $0x20] sm:$0xff] }
0x1015   :  { %3116 = vmax.xlane.f32.xlu0 %v3115_v41  ;;  %v2961_v19 = vpop.f32.mrf.mxu1 }
0x1016   :  { %v2962_v28 = vadd.f32 %v2961_v19, %v2815_v20 }
0x1017   :  { %v4609_v27 = vpop.f32.mrf.mxu1 }
0x1019   :  { %v3109_v31 = vpop.f32.mrf.mxu1 }
0x101a   :  { %v3114_v16 = vmul.f32 0.35355338, %v3109_v31 }
0x101b   :  { %v4619_v30 = vpop.f32.mrf.mxu1 }
0x101c   :  { %v3118_v15 = vsel %vm523_vm6, %v3114_v16, -inf  ;;  %v4203_v30 = vld [vmem:[%s5514_s5 + $0x1] ss:$0 sm:$0xff] }
0x101d   :  { %3119 = vmax.xlane.f32.xlu1 %v3118_v15 }
0x109e   :  { %v3117_v21 = vpop.xlane.xlu0 %3116 }
0x109f   :  { %v3121_v29 = vsub.f32 %v3113_v24, %v3117_v21  ;;  %v3612_v24 = vld [vmem:[#allocation3 + $0x30] sm:$0xff] }
0x10a1   :  { %v3123_v32 = vmul.f32 1.442695, %v3121_v29 }
0x10a3   :  { %4764 = vpow2.f32 %v3123_v32 }
0x10a6   :  { %v3120_v34 = vpop.xlane.xlu1 %3119 }
0x10a7   :  { %v3122_v35 = vsub.f32 %v3114_v16, %v3120_v34 }
0x10a9   :  { %v3125_v36 = vmul.f32 1.442695, %v3122_v35 }
0x10ab   :  { %4766 = vpow2.f32 %v3125_v36 }
0x10b0   :  { %v4765_v37 = vpop.eup %4764 }
0x10b1   :  { %v3127_v14 = vsel %vm523_vm6, %v4765_v37, 0.0 }
0x10b2   :  { %3128 = vadd.xlane.f32.xlu0 %v3127_v14 }
0x10b8   :  { %v4767_v38 = vpop.eup %4766 }
0x10b9   :  { %v3130_v39 = vsel %vm523_vm6, %v4767_v38, 0.0 }
0x10ba   :  { %3131 = vadd.xlane.f32.xlu1 %v3130_v39 }
0x113b   :  { %v3129_v40 = vpop.xlane.xlu0 %3128 }
0x113c   :  { %4768 = vrcp.f32 %v3129_v40 }
0x1143   :  { %v3132_v42 = vpop.xlane.xlu1 %3131 }
0x1144   :  { %4770 = vrcp.f32 %v3132_v42 }
0x1149   :  { %v4769_v43 = vpop.eup %4768 }
0x114a   :  { %v3135_v44 = vmul.f32 %v4769_v43, %v4765_v37 }
0x114c   :  { %4623 = vmatmul.mubr.msk.f32.vlgmr.msra.gmra.mxu0 %vm523_vm6, %v3135_v44 }
0x114d   :  { %4631 = vmatpush3.xpose.msk.msra.mxu0 %vm104_vm0, %v5298_v63  ;;  %4632 = vmatprep.mubr.msk.f32.mxu0 %vm4837_vm1, %v4836_v17 }
0x114e   :  { %4640 = vmatprep.subr.mxu0 %v4836_v17 }
0x1150   :  { %4633 = vmatmul.mubr.msk.f32.vlgmr.msra.gmra.mxu0 %vm104_vm0, %v3287_v45 }
0x1151   :  { %v4771_v49 = vpop.eup %4770  ;;  %4641 = vmatpush3.msra.mxu0 %v3459_v46  ;;  %4642 = vmatprep.mubr.msk.f32.mxu0 %vm4837_vm1, %v4836_v17 }
0x1152   :  { %v3136_v50 = vmul.f32 %v4771_v49, %v4767_v38  ;;  %4650 = vmatprep.subr.mxu0 %v3613_v23  ;;  %v3755_v49 = vld [vmem:[#allocation5 + $0x38] sm:$0xff] }
0x1154   :  { %4628 = vmatmul.mubr.msk.f32.vlgmr.msra.gmra.mxu1 %vm523_vm6, %v3136_v50  ;;  %v3753_v50 = vld [vmem:[#allocation5 + $0x28] sm:$0xff] }
0x1155   :  { %4636 = vmatpush3.xpose.msk.msra.mxu1 %vm104_vm0, %v5312_v3  ;;  %4637 = vmatprep.mubr.msk.f32.mxu1 %vm4837_vm1, %v4836_v17 }
0x1156   :  { %4645 = vmatprep.subr.mxu1 %v4836_v17 }
0x1158   :  { %4638 = vmatmul.mubr.msk.f32.vlgmr.msra.gmra.mxu1 %vm104_vm0, %v3288_v59  ;;  %v3752_v59 = vld [vmem:[#allocation5 + $0x20] sm:$0xff] }
0x1159   :  { %4646 = vmatpush3.msra.mxu1 %v3460_v62  ;;  %4647 = vmatprep.mubr.msk.f32.mxu1 %vm4837_vm1, %v4836_v17  ;;  %v4221_v62 = vld [vmem:[%s5519_s10 + $0x78] sm:$0xff] }
0x115a   :  { %4661 = vmatprep.subr.mxu1 %v3755_v49 }
0x120c   :  { %v3208_v63 = vpop.f32.mrf.mxu0 }
0x120d   :  { %v3285_v51 = vadd.f32 %v3208_v63, %v2889_v13  ;;  %v4220_v63 = vld [vmem:[%s5519_s10 + $0x70] sm:$0xff] }
0x120e   :  { %v4624_v3 = vpop.f32.mrf.mxu0 }
0x120f   :  { %v4218_v3 = vld [vmem:[%s5519_s10 + $0x60] sm:$0xff] }
0x1210   :  { %v3358_v52 = vpop.f32.mrf.mxu0 }
0x1211   :  { %v3435_v53 = vmul.f32 0.35355338, %v3358_v52 }
0x1212   :  { %v4634_v54 = vpop.f32.mrf.mxu0 }
0x1213   :  { %v3437_v55 = vsel %vm523_vm6, %v3435_v53, -inf }
0x1214   :  { %3438 = vmax.xlane.f32.xlu0 %v3437_v55  ;;  %v3281_v0 = vpop.f32.mrf.mxu1 }
0x1215   :  { %v3286_v56 = vadd.f32 %v3281_v0, %v2962_v28 }
0x1216   :  { %v4629_v57 = vpop.f32.mrf.mxu1 }
0x1218   :  { %v3431_v58 = vpop.f32.mrf.mxu1 }
0x1219   :  { %v3436_v22 = vmul.f32 0.35355338, %v3431_v58  ;;  %v4208_v58 = vld [vmem:[%s5515_s6 + $0x1] ss:$0 sm:$0xff] }
0x121a   :  { %v4639_v6 = vpop.f32.mrf.mxu1 }
0x121b   :  { %v3440_v60 = vsel %vm523_vm6, %v3436_v22, -inf }
0x121c   :  { %3441 = vmax.xlane.f32.xlu1 %v3440_v60 }
0x129d   :  { %v3439_v61 = vpop.xlane.xlu0 %3438 }
0x129e   :  { %v3443_v17 = vsub.f32 %v3435_v53, %v3439_v61 }
0x12a0   :  { %v3445_v1 = vmul.f32 1.442695, %v3443_v17  ;;  %v4209_v17 = vld [vmem:[%s5516_s7 + $0x1] ss:$0 sm:$0xff] }
0x12a2   :  { %4772 = vpow2.f32 %v3445_v1 }
0x12a5   :  { %v3442_v2 = vpop.xlane.xlu1 %3441 }
0x12a6   :  { %v3444_v4 = vsub.f32 %v3436_v22, %v3442_v2 }
0x12a8   :  { %v3447_v5 = vmul.f32 1.442695, %v3444_v4 }
0x12aa   :  { %4774 = vpow2.f32 %v3447_v5  ;;  %v4217_v5 = vld [vmem:[%s5519_s10 + $0x58] sm:$0xff] }
0x12af   :  { %v4773_v7 = vpop.eup %4772 }
0x12b0   :  { %v3449_v8 = vsel %vm523_vm6, %v4773_v7, 0.0 }
0x12b1   :  { %3450 = vadd.xlane.f32.xlu0 %v3449_v8  ;;  %v4215_v8 = vld [vmem:[%s5519_s10 + $0x48] sm:$0xff] }
0x12b7   :  { %v4775_v25 = vpop.eup %4774 }
0x12b8   :  { %v3452_v9 = vsel %vm523_vm6, %v4775_v25, 0.0 }
0x12b9   :  { %3453 = vadd.xlane.f32.xlu1 %v3452_v9  ;;  %v4211_v9 = vld [vmem:[%s5518_s9 + $0x1] ss:$0 sm:$0xff] }
0x133a   :  { %v3451_v10 = vpop.xlane.xlu0 %3450 }
0x133b   :  { %4776 = vrcp.f32 %v3451_v10 }
0x1342   :  { %v3454_v11 = vpop.xlane.xlu1 %3453 }
0x1343   :  { %4778 = vrcp.f32 %v3454_v11 }
0x1348   :  { %v4777_v12 = vpop.eup %4776 }
0x1349   :  { %v3457_v13 = vmul.f32 %v4777_v12, %v4773_v7  ;;  %v4216_v7 = vld [vmem:[%s5519_s10 + $0x50] sm:$0xff] }
0x134b   :  { %4643 = vmatmul.mubr.msk.f32.vlgmr.msra.gmra.mxu0 %vm523_vm6, %v3457_v13 }
0x134c   :  { %4651 = vmatpush3.msra.mxu0 %v3613_v23  ;;  %v4223_v23 = vld [vmem:[%s5520_s11 + $0x1] ss:$0 sm:$0xff] }
0x134d   :  { %4652 = vmatprep.subr.mxu0 %v3612_v24 }
0x134e   :  { %4653 = vmatpush3.msra.mxu0 %v3612_v24 }
0x134f   :  { %4654 = vmatprep.subr.mxu0 %v3611_v33 }
0x1350   :  { %v4779_v18 = vpop.eup %4778  ;;  %4655 = vmatpush3.msra.mxu0 %v3611_v33 }
0x1351   :  { %v3458_v20 = vmul.f32 %v4779_v18, %v4775_v25  ;;  %4656 = vmatprep.subr.mxu0 %v3610_v26  ;;  %v4214_v25 = vld [vmem:[%s5519_s10 + $0x40] sm:$0xff] }
0x1352   :  { %4657 = vmatpush3.msra.mxu0 %v3610_v26 }
0x1353   :  { %4648 = vmatmul.mubr.msk.f32.vlgmr.msra.gmra.mxu1 %vm523_vm6, %v3458_v20  ;;  %4672 = vmatprep.subr.mxu0 %v4221_v62 }
0x1354   :  { %4662 = vmatpush3.msra.mxu1 %v3755_v49 }
0x140b   :  { %v3530_v41 = vpop.f32.mrf.mxu0 }
0x140c   :  { %v3607_v19 = vadd.f32 %v3530_v41, %v3285_v51  ;;  %v4219_v51 = vld [vmem:[%s5519_s10 + $0x68] sm:$0xff] }
0x140d   :  { %v4644_v28 = vpop.f32.mrf.mxu0 }
0x140e   :  { %4658 = vmatprep.mubr.msk.f32.mxu0 %vm104_vm0, %v3607_v19 }
0x1413   :  { %v3603_v27 = vpop.f32.mrf.mxu1 }
0x1414   :  { %v3608_v31 = vadd.f32 %v3603_v27, %v3286_v56 }
0x1415   :  { %v4649_v16 = vpop.f32.mrf.mxu1 }
0x1416   :  { %4659 = vmatmul.mubr.msk.f32.vlgmr.msra.gmra.mxu0 %vm104_vm0, %v3608_v31 }
0x1417   :  { %4673 = vmatpush3.msra.mxu0 %v4221_v62 }
0x1418   :  { %4674 = vmatprep.subr.mxu0 %v4220_v63 }
0x1419   :  { %4675 = vmatpush3.msra.mxu0 %v4220_v63 }
0x141a   :  { %4676 = vmatprep.subr.mxu0 %v4219_v51 }
0x141b   :  { %4677 = vmatpush3.msra.mxu0 %v4219_v51  ;;  %v4229_v51 = vld [vmem:[%s5522_s13 + $0x1] ss:$0 sm:$0xff] }
0x141c   :  { %4678 = vmatprep.subr.mxu0 %v4218_v3 }
0x141d   :  { %4679 = vmatpush3.msra.mxu0 %v4218_v3 }
0x141e   :  { %4680 = vmatprep.subr.mxu0 %v4217_v5 }
0x141f   :  { %4681 = vmatpush3.msra.mxu0 %v4217_v5 }
0x1420   :  { %4682 = vmatprep.subr.mxu0 %v4216_v7 }
0x1421   :  { %4683 = vmatpush3.msra.mxu0 %v4216_v7 }
0x1422   :  { %4684 = vmatprep.subr.mxu0 %v4215_v8 }
0x1423   :  { %4685 = vmatpush3.msra.mxu0 %v4215_v8 }
0x1424   :  { %4686 = vmatprep.subr.mxu0 %v4214_v25 }
0x1425   :  { %4687 = vmatpush3.msra.mxu0 %v4214_v25 }
0x14d6   :  { %v4660_v15 = vpop.f32.mrf.mxu0 }
0x14d7   :  { %v3700_v21 = vadd.f32 %v4660_v15, %v4203_v30 }
0x14d8   :  { %v3694_v29 = vpop.f32.mrf.mxu0 }
0x14d9   :  { %v3695_v32 = vadd.f32 %v4203_v30, %v3694_v29  ;;  %v3704_v34 = vadd.f32 %v3700_v21, %v5257_v48 }
0x14db   :  { %v3712_v35 = vsel %vm104_vm0, %v3704_v34, 0.0  ;;  %v3703_v36 = vadd.f32 %v3695_v32, %v5255_v47  ;;  %v3754_v47 = vld [vmem:[#allocation5 + $0x30] sm:$0xff] }
0x14dc   :  { %3713 = vadd.xlane.f32.xlu1 %v3712_v35  ;;  %4663 = vmatprep.subr.mxu1 %v3754_v47 }
0x14dd   :  { %v3709_v37 = vsel %vm104_vm0, %v3703_v36, 0.0  ;;  %4664 = vmatpush3.msra.mxu1 %v3754_v47  ;;  %v4228_v47 = vld [vmem:[%s5521_s12 + $0x1] ss:$0 sm:$0xff] }
0x14de   :  { %3710 = vadd.xlane.f32.xlu0 %v3709_v37  ;;  %4665 = vmatprep.subr.mxu1 %v3753_v50 }
0x14df   :  { %4666 = vmatpush3.msra.mxu1 %v3753_v50 }
0x14e0   :  { %4667 = vmatprep.subr.mxu1 %v3752_v59 }
0x14e1   :  { %4668 = vmatpush3.msra.mxu1 %v3752_v59 }
0x1565   :  { %v3714_v14 = vpop.xlane.xlu1 %3713 }
0x1566   :  { %v3716_v38 = vmul.f32 0.03125, %v3714_v14  ;;  %v3996_v14 = vld [vmem:[%s5523_s14 + $0x18] sm:$0xff] }
0x1567   :  { %v3711_v39 = vpop.xlane.xlu0 %3710  ;;  %4691 = vmatprep.subr.mxu1 %v3996_v14 }
0x1568   :  { %v3718_v40 = vsub.f32 %v3704_v34, %v3716_v38  ;;  %v3715_v42 = vmul.f32 0.03125, %v3711_v39  ;;  %v3995_v38 = vld [vmem:[%s5523_s14 + $0x10] sm:$0xff]  ;;  %v3994_v39 = vld [vmem:[%s5523_s14 + $0x8] sm:$0xff] }
0x156a   :  { %v3717_v43 = vsub.f32 %v3703_v36, %v3715_v42  ;;  %v3720_v44 = vmul.f32 %v3718_v40, %v3718_v40 }
0x156c   :  { %v3724_v45 = vsel %vm104_vm0, %v3720_v44, 0.0  ;;  %v3719_v46 = vmul.f32 %v3717_v43, %v3717_v43 }
0x156d   :  { %3725 = vadd.xlane.f32.xlu1 %v3724_v45 }
0x156e   :  { %v3721_v48 = vsel %vm104_vm0, %v3719_v46, 0.0 }
0x156f   :  { %3722 = vadd.xlane.f32.xlu0 %v3721_v48 }
0x15f6   :  { %v3726_v52 = vpop.xlane.xlu1 %3725 }
0x15f7   :  { %v3728_v53 = vmul.f32 0.03125, %v3726_v52 }
0x15f8   :  { %v3723_v54 = vpop.xlane.xlu0 %3722 }
0x15f9   :  { %v3730_v55 = vadd.f32 1e-05, %v3728_v53  ;;  %v3727_v0 = vmul.f32 0.03125, %v3723_v54  ;;  %v4230_v54 = vld [vmem:[#allocation2] ss:$0 sm:$0xff] }
0x15fb   :  { %4780 = vrsqrt.f32 %v3730_v55  ;;  %v3729_v56 = vadd.f32 1e-05, %v3727_v0 }
0x15fd   :  { %4782 = vrsqrt.f32 %v3729_v56 }
0x1608   :  { %v4781_v57 = vpop.eup %4780 }
0x1609   :  { %v3734_v22 = vmul.f32 %v4781_v57, %v3718_v40  ;;  %v3993_v40 = vld [vmem:[%s5523_s14] sm:$0xff] }
0x160a   :  { %v4783_v6 = vpop.eup %4782 }
0x160b   :  { %v3733_v60 = vmul.f32 %v4783_v6, %v3717_v43  ;;  %v3742_v61 = vmul.f32 %v4208_v58, %v3734_v22 }
0x160d   :  { %v3741_v1 = vmul.f32 %v4208_v58, %v3733_v60  ;;  %v3750_v4 = vadd.f32 %v4209_v17, %v3742_v61 }
0x160f   :  { %v3749_v2 = vadd.f32 %v4209_v17, %v3741_v1 }
0x1611   :  { %4669 = vmatprep.mubr.msk.f32.mxu1 %vm104_vm0, %v3749_v2 }
0x1612   :  { %4670 = vmatmul.mubr.msk.f32.vlgmr.msra.gmra.mxu1 %vm104_vm0, %v3750_v4 }
0x1613   :  { %4692 = vmatpush3.msra.mxu1 %v3996_v14 }
0x1614   :  { %4693 = vmatprep.subr.mxu1 %v3995_v38 }
0x1615   :  { %4694 = vmatpush3.msra.mxu1 %v3995_v38 }
0x1616   :  { %4695 = vmatprep.subr.mxu1 %v3994_v39 }
0x1617   :  { %4696 = vmatpush3.msra.mxu1 %v3994_v39 }
0x1618   :  { %4697 = vmatprep.subr.mxu1 %v3993_v40 }
0x1619   :  { %4698 = vmatpush3.msra.mxu1 %v3993_v40 }
0x16d2   :  { %v4671_v10 = vpop.f32.mrf.mxu1 }
0x16d3   :  { %v3842_v11 = vadd.f32 %v4671_v10, %v4211_v9 }
0x16d4   :  { %v3836_v12 = vpop.f32.mrf.mxu1 }
0x16d5   :  { %v3837_v13 = vadd.f32 %v4211_v9, %v3836_v12  ;;  %v3846_v20 = vmax.f32 %v3842_v11, 0.0 }
0x16d7   :  { %v3845_v18 = vmax.f32 %v3837_v13, 0.0 }
0x16d9   :  { %4688 = vmatprep.mubr.msk.f32.mxu0 %vm1921_vm13, %v3845_v18 }
0x16da   :  { %4689 = vmatmul.mubr.msk.f32.vlgmr.msra.gmra.mxu0 %vm1921_vm13, %v3846_v20 }
0x179a   :  { %v4690_v24 = vpop.f32.mrf.mxu0 }
0x179b   :  { %v3942_v33 = vadd.f32 %v4690_v24, %v4223_v23 }
0x179c   :  { %v3936_v26 = vpop.f32.mrf.mxu0 }
0x179d   :  { %v3937_v41 = vadd.f32 %v4223_v23, %v3936_v26  ;;  %v3946_v19 = vadd.f32 %v3942_v33, %v3750_v4 }
0x179f   :  { %v3954_v28 = vsel %vm104_vm0, %v3946_v19, 0.0  ;;  %v3945_v27 = vadd.f32 %v3937_v41, %v3749_v2 }
0x17a0   :  { %3955 = vadd.xlane.f32.xlu1 %v3954_v28 }
0x17a1   :  { %v3951_v31 = vsel %vm104_vm0, %v3945_v27, 0.0 }
0x17a2   :  { %3952 = vadd.xlane.f32.xlu0 %v3951_v31 }
0x1829   :  { %v3956_v16 = vpop.xlane.xlu1 %3955 }
0x182a   :  { %v3958_v30 = vmul.f32 0.03125, %v3956_v16 }
0x182b   :  { %v3953_v15 = vpop.xlane.xlu0 %3952 }
0x182c   :  { %v3960_v21 = vsub.f32 %v3946_v19, %v3958_v30  ;;  %v3957_v29 = vmul.f32 0.03125, %v3953_v15 }
0x182e   :  { %v3959_v32 = vsub.f32 %v3945_v27, %v3957_v29  ;;  %v3962_v34 = vmul.f32 %v3960_v21, %v3960_v21 }
0x1830   :  { %v3966_v35 = vsel %vm104_vm0, %v3962_v34, 0.0  ;;  %v3961_v36 = vmul.f32 %v3959_v32, %v3959_v32 }
0x1831   :  { %3967 = vadd.xlane.f32.xlu1 %v3966_v35 }
0x1832   :  { %v3963_v37 = vsel %vm104_vm0, %v3961_v36, 0.0 }
0x1833   :  { %3964 = vadd.xlane.f32.xlu0 %v3963_v37 }
0x18ba   :  { %v3968_v42 = vpop.xlane.xlu1 %3967 }
0x18bb   :  { %v3970_v43 = vmul.f32 0.03125, %v3968_v42 }
0x18bc   :  { %v3965_v44 = vpop.xlane.xlu0 %3964 }
0x18bd   :  { %v3972_v45 = vadd.f32 1e-05, %v3970_v43  ;;  %v3969_v46 = vmul.f32 0.03125, %v3965_v44 }
0x18bf   :  { %4784 = vrsqrt.f32 %v3972_v45  ;;  %v3971_v48 = vadd.f32 1e-05, %v3969_v46 }
0x18c1   :  { %4786 = vrsqrt.f32 %v3971_v48 }
0x18cc   :  { %v4785_v49 = vpop.eup %4784 }
0x18cd   :  { %v3976_v50 = vmul.f32 %v4785_v49, %v3960_v21 }
0x18ce   :  { %v4787_v59 = vpop.eup %4786 }
0x18cf   :  { %v3975_v62 = vmul.f32 %v4787_v59, %v3959_v32  ;;  %v3984_v63 = vmul.f32 %v4228_v47, %v3976_v50 }
0x18d1   :  { %v3983_v3 = vmul.f32 %v4228_v47, %v3975_v62  ;;  %v3992_v53 = vadd.f32 %v4229_v51, %v3984_v63 }
0x18d3   :  { %v3991_v52 = vadd.f32 %v4229_v51, %v3983_v3 }
0x18d5   :  { %4699 = vmatprep.mubr.msk.f32.mxu1 %vm104_vm0, %v3991_v52 }
0x18d6   :  { %4700 = vmatmul.mubr.msk.f32.vlgmr.msra.gmra.mxu1 %vm104_vm0, %v3992_v53 }
0x1996   :  { %v4701_v55 = vpop.f32.mrf.mxu1 }
0x1997   :  { %v4082_v0 = vadd.f32 %v4701_v55, %v4230_v54 }
0x1998   :  { %v4076_v56 = vpop.f32.mrf.mxu1 }
0x1999   :  { %4087 = vst.msk [vmem:[%s5525_s16 + $0x8] sm:$0xff] %vm4085_vm14, %v4082_v0  ;;  %v4077_v57 = vadd.f32 %v4230_v54, %v4076_v56 }
0x199b   :  { %4086 = vst.msk [vmem:[%s5525_s16] sm:$0xff] %vm4085_vm14, %v4077_v57 }
0x199c   :  { %4092 = vsyncpa [#allocation4], 1 }
0x199d   :  { %4093 = vsyncpa [#allocation6], 1 }

</bundles_post_ra>
